<compile_context>
chip_gen: v6e
topology: v6e:2x2x1
jax: 0.10.0
libtpu: 0.0.40
codegen_flags: <defaults>
</compile_context>

<pallas_src>
import functools

import jax
import jax.numpy as jnp
import numpy as np
from jax import lax
from jax.experimental import pallas as pl
from jax.experimental.pallas import tpu as pltpu


def _round_up(x: int, m: int) -> int:
    return ((x + m - 1) // m) * m


def make_quantizer_params(nq: int = 20, vmin: float = -1.0, vmax: float = 1.0):
    """Deterministic init matching SoftBinAPLoss.__init__ (Conv1d weights/biases).

    Returned as tuples of Python floats so they can be baked into the kernel as
    immediates (no DMA, no lane-dim-1 weight blocks)."""
    gap = vmax - vmin
    a = (nq - 1) / gap
    w = np.zeros((2 * nq,), dtype=np.float64)
    b = np.zeros((2 * nq,), dtype=np.float64)
    w[:nq] = -a
    b[:nq] = a * vmin + np.arange(nq, 0, -1)
    w[nq:] = a
    b[nq:] = np.arange(2 - nq, 2, 1) - a * vmin
    w[0] = w[-1] = 0.0
    b[0] = b[-1] = 1.0
    w1 = tuple(float(v) for v in w[:nq])
    b1 = tuple(float(v) for v in b[:nq])
    w2 = tuple(float(v) for v in w[nq:])
    b2 = tuple(float(v) for v in b[nq:])
    return w1, b1, w2, b2


def _softbin_ap_kernel(ref_ref, embt_ref, rlab_ref, qlab_ref, out_ref,
                       nbs_acc, rec_acc, *,
                       nq, w1, b1, w2, b2, m_total, block_m, mask_cols):
    """Grid = (N tiles [parallel], M tiles [arbitrary/reduction]).

    ref_ref  : (TM, D)   reference embedding rows for this M tile
    embt_ref : (D, TN)   transposed query embeddings for this N tile
    rlab_ref : (TM, 1)   int32 reference labels
    qlab_ref : (1, TN)   int32 query labels
    out_ref  : (1, 1, TN) per-query AP (written only at the last M tile)
    nbs_acc, rec_acc : (nq, TN) f32 VMEM accumulators
    """
    j = pl.program_id(1)
    n_j = pl.num_programs(1)

    @pl.when(j == 0)
    def _init():
        nbs_acc[...] = jnp.zeros_like(nbs_acc)
        rec_acc[...] = jnp.zeros_like(rec_acc)

    # scores^T tile: (TM, TN) = ref_tile @ emb^T tile   (canonical (M,K)@(K,N) -> MXU)
    scores = lax.dot_general(
        ref_ref[...], embt_ref[...],
        dimension_numbers=(((1,), (0,)), ((), ())),
        preferred_element_type=jnp.float32,
    )

    # Binary label-match matrix computed in-kernel: (TM, TN)
    tgt = (rlab_ref[...] == qlab_ref[...]).astype(jnp.float32)

    if mask_cols:
        # Zero out contributions from padded reference rows (global row >= M).
        m_idx = lax.broadcasted_iota(jnp.int32, (block_m, 1), 0) + j * block_m
        valid = (m_idx < m_total).astype(jnp.float32)            # (TM, 1)

    # Unrolled per-bin loop: one (TM, TN) tile live at a time; quantizer params
    # are scalar immediates.  q_c = clamp(min(w1_c*s + b1_c, w2_c*s + b2_c), 0).
    for c in range(nq):
        w1c, b1c, w2c, b2c = w1[c], b1[c], w2[c], b2[c]
        if w1c == 0.0 and b1c >= 0.0:          # edge bin (c == 0): q1 == b1c
            q = jnp.clip(scores * w2c + b2c, 0.0, b1c)
        elif w2c == 0.0 and b2c >= 0.0:        # edge bin (c == nq-1): q2 == b2c
            q = jnp.clip(scores * w1c + b1c, 0.0, b2c)
        else:
            q = jnp.maximum(
                jnp.minimum(scores * w1c + b1c, scores * w2c + b2c), 0.0)
        if mask_cols:
            q = q * valid
        # Reduce over the reference axis (sublanes) -> lane-dense (1, TN) rows.
        nbs_acc[c:c + 1, :] += jnp.sum(q, axis=0, keepdims=True)
        rec_acc[c:c + 1, :] += jnp.sum(q * tgt, axis=0, keepdims=True)

    @pl.when(j == n_j - 1)
    def _finalize():
        nbs = nbs_acc[...]                      # (nq, TN)
        rec = rec_acc[...]                      # (nq, TN)
        # cumsum over bins (axis 0) via lower-triangular ones matmul (MXU).
        row = lax.broadcasted_iota(jnp.int32, (nq, nq), 0)
        col = lax.broadcasted_iota(jnp.int32, (nq, nq), 1)
        tri = (col <= row).astype(jnp.float32)  # tri[k, c] = 1 if c <= k
        cum_rec = lax.dot_general(tri, rec, dimension_numbers=(((1,), (0,)), ((), ())),
                                  preferred_element_type=jnp.float32)
        cum_nbs = lax.dot_general(tri, nbs, dimension_numbers=(((1,), (0,)), ((), ())),
                                  preferred_element_type=jnp.float32)
        prec = cum_rec / (1e-16 + cum_nbs)                      # (nq, TN)
        rec_n = rec / jnp.sum(rec, axis=0, keepdims=True)       # matches torch (no eps)
        ap = jnp.sum(prec * rec_n, axis=0, keepdims=True)       # (1, TN), lane-dense
        out_ref[...] = ap[None]


def softbin_ap_loss(embeddings, labels, ref_embeddings=None, ref_labels=None, *,
                    nq: int = 20, vmin: float = -1.0, vmax: float = 1.0,
                    block_n: int = 128, block_m: int = 512,
                    matmul_dtype=jnp.float32):
    """Pallas implementation of SoftBinAPLoss.forward (return_type='1-mAP', qw=None).

    Set matmul_dtype=jnp.bfloat16 to halve embedding DMA / double MXU throughput on
    v6e/v7x (validate tolerance against the f32 reference before relying on it)."""
    if ref_embeddings is None:
        ref_embeddings = embeddings
        ref_labels = labels
    assert ref_labels is not None

    embeddings = embeddings.astype(matmul_dtype)
    ref_embeddings = ref_embeddings.astype(matmul_dtype)
    labels = labels.astype(jnp.int32)
    ref_labels = ref_labels.astype(jnp.int32)

    N, D = embeddings.shape
    M, D2 = ref_embeddings.shape
    assert D == D2 and labels.shape == (N,) and ref_labels.shape == (M,)

    # Tile selection. Queries (lane dim) / references (sublane dim).
    if N <= block_n:
        tn = _round_up(N, 8)
    else:
        assert block_n % 128 == 0, "block_n must be a multiple of 128 when N > block_n"
        tn = block_n
    if M <= block_m:
        tm = _round_up(M, 8)
    else:
        assert block_m % 8 == 0, "block_m must be a multiple of 8 when M > block_m"
        tm = block_m

    n_pad = _round_up(N, tn)
    m_pad = _round_up(M, tm)
    n_i = n_pad // tn
    n_j = m_pad // tm
    mask_cols = (m_pad != M)

    emb_p = jnp.pad(embeddings, ((0, n_pad - N), (0, 0)))
    ref_p = jnp.pad(ref_embeddings, ((0, m_pad - M), (0, 0)))
    emb_t = emb_p.T                                               # (D, N_pad)
    qlab_p = jnp.pad(labels, (0, n_pad - N), constant_values=-1).reshape(1, n_pad)
    rlab_p = jnp.pad(ref_labels, (0, m_pad - M), constant_values=-2).reshape(m_pad, 1)

    w1, b1, w2, b2 = make_quantizer_params(nq, vmin, vmax)
    kernel = functools.partial(
        _softbin_ap_kernel, nq=nq, w1=w1, b1=b1, w2=w2, b2=b2,
        m_total=M, block_m=tm, mask_cols=mask_cols)

    ap_tiles = pl.pallas_call(
        kernel,
        out_shape=jax.ShapeDtypeStruct((n_i, 1, tn), jnp.float32),
        grid=(n_i, n_j),
        in_specs=[
            pl.BlockSpec((tm, D), lambda i, j: (j, 0)),    # reference rows
            pl.BlockSpec((D, tn), lambda i, j: (0, i)),    # query embeddings^T
            pl.BlockSpec((tm, 1), lambda i, j: (j, 0)),    # reference labels
            pl.BlockSpec((1, tn), lambda i, j: (0, i)),    # query labels
        ],
        out_specs=pl.BlockSpec((1, 1, tn), lambda i, j: (i, 0, 0)),
        scratch_shapes=[
            pltpu.VMEM((nq, tn), jnp.float32),             # nbs accumulator
            pltpu.VMEM((nq, tn), jnp.float32),             # rec accumulator
        ],
        compiler_params=pltpu.CompilerParams(
            dimension_semantics=("parallel", "arbitrary"),
            vmem_limit_bytes=32 * 1024 * 1024),
    )(ref_p, emb_t, rlab_p, qlab_p)

    ap = ap_tiles.reshape(-1)[:N]        # per-query AP, padded lanes dropped
    return 1.0 - jnp.mean(ap)            # return_type == '1-mAP', qw=None


def softbin_ap_loss_ref(embeddings, labels, ref_embeddings=None, ref_labels=None,
                        *, nq=20, vmin=-1.0, vmax=1.0):
    """Pure-JAX reference (mirrors the PyTorch forward)."""
    if ref_embeddings is None:
        ref_embeddings, ref_labels = embeddings, labels
    w1, b1, w2, b2 = make_quantizer_params(nq, vmin, vmax)
    w1 = jnp.asarray(w1, jnp.float32)[None, :, None]
    b1 = jnp.asarray(b1, jnp.float32)[None, :, None]
    w2 = jnp.asarray(w2, jnp.float32)[None, :, None]
    b2 = jnp.asarray(b2, jnp.float32)[None, :, None]
    scores = embeddings @ ref_embeddings.T
    target = (labels[:, None] == ref_labels[None, :]).astype(jnp.float32)
    s = scores[:, None, :]
    q = jnp.clip(jnp.minimum(s * w1 + b1, s * w2 + b2), 0.0, None)
    nbs = q.sum(-1)
    rec = (q * target[:, None, :]).sum(-1)
    prec = jnp.cumsum(rec, -1) / (1e-16 + jnp.cumsum(nbs, -1))
    rec = rec / rec.sum(-1, keepdims=True)
    ap = (prec * rec).sum(-1)
    return 1.0 - ap.mean()


if __name__ == "__main__":
    key = jax.random.PRNGKey(0)
    nq = 20
    k1, k2, k3, k4, k5 = jax.random.split(key, 5)

    # Test 1: ref_embeddings default to embeddings; single (1, 1) grid, no padding.
    N, D = 8, 32
    emb = jax.random.normal(k1, (N, D), dtype=jnp.float32)
    emb = emb / jnp.linalg.norm(emb, axis=-1, keepdims=True)     # scores in [-1, 1]
    labels = jax.random.randint(k2, (N,), 0, 3)                  # 3 classes
    loss1 = jax.block_until_ready(softbin_ap_loss(emb, labels, nq=nq))
    ref1 = softbin_ap_loss_ref(emb, labels, nq=nq)
    assert jnp.allclose(loss1, ref1, atol=1e-4, rtol=1e-4), (loss1, ref1)

    # Test 2: separate refs, multi M-tile reduction, padded/masked reference rows
    # and padded query lanes (exercises accumulator init/finalize + masking).
    Nq, M, D2 = 10, 20, 32
    qe = jax.random.normal(k3, (Nq, D2), dtype=jnp.float32)
    qe = qe / jnp.linalg.norm(qe, axis=-1, keepdims=True)
    re = jax.random.normal(k4, (M, D2), dtype=jnp.float32)
    re = re / jnp.linalg.norm(re, axis=-1, keepdims=True)
    ql = jax.random.randint(k5, (Nq,), 0, 3)
    rl = jnp.arange(M, dtype=jnp.int32) % 3                      # all classes present
    loss2 = jax.block_until_ready(
        softbin_ap_loss(qe, ql, re, rl, nq=nq, block_m=8))       # forces grid=(1, 3)
    ref2 = softbin_ap_loss_ref(qe, ql, re, rl, nq=nq)
    assert jnp.allclose(loss2, ref2, atol=1e-4, rtol=1e-4), (loss2, ref2)

    print("KERNEL_OK")
</pallas_src>

<mosaic_0001>
module attributes {stable_mosaic.version = 11 : i64} {
  func.func @_softbin_ap_kernel(%arg0: i32, %arg1: i32, %arg2: memref<8x32xf32, #tpu.memory_space<vmem>>, %arg3: memref<32x8xf32, #tpu.memory_space<vmem>>, %arg4: memref<8x1xi32, #tpu.memory_space<vmem>>, %arg5: memref<1x8xi32, #tpu.memory_space<vmem>>, %arg6: memref<1x1x8xf32, #tpu.memory_space<vmem>>, %arg7: memref<20x8xf32, #tpu.memory_space<vmem>>, %arg8: memref<20x8xf32, #tpu.memory_space<vmem>>) attributes {dimension_semantics = [#tpu.dimension_semantics<parallel>, #tpu.dimension_semantics<arbitrary>], iteration_bounds = array<i64: 1, 1>, scalar_prefetch = 0 : i64, scratch_operands = 2 : i64, tpu.core_type = #tpu.core_type<tc>, window_params = [{transform_indices = @transform_0, window_bounds = array<i64: 8, 32>}, {transform_indices = @transform_1, window_bounds = array<i64: 32, 8>}, {transform_indices = @transform_2, window_bounds = array<i64: 8, 1>}, {transform_indices = @transform_3, window_bounds = array<i64: 1, 8>}, {transform_indices = @transform_4, window_bounds = array<i64: 1, 1, 8>}]} {
    %c0_i32 = arith.constant 0 : i32
    %0 = arith.cmpi eq, %arg1, %c0_i32 : i32
    %1 = arith.extui %0 : i1 to i32
    %c0_i32_0 = arith.constant 0 : i32
    %2 = arith.cmpi ne, %1, %c0_i32_0 : i32
    scf.if %2 {
      %cst_289 = arith.constant 0.000000e+00 : f32
      %450 = vector.broadcast %cst_289 : f32 to vector<20x8xf32>
      %c0_290 = arith.constant 0 : index
      %c0_291 = arith.constant 0 : index
      %451 = vector.load %arg7[%c0_290, %c0_291] : memref<20x8xf32, #tpu.memory_space<vmem>>, vector<20x8xf32>
      tpu.vector_store %arg7[%c0_290, %c0_291], %450 {strides = array<i32>} : memref<20x8xf32, #tpu.memory_space<vmem>>, vector<20x8xf32>,
      %cst_292 = arith.constant 0.000000e+00 : f32
      %452 = vector.broadcast %cst_292 : f32 to vector<20x8xf32>
      %c0_293 = arith.constant 0 : index
      %c0_294 = arith.constant 0 : index
      %453 = vector.load %arg8[%c0_293, %c0_294] : memref<20x8xf32, #tpu.memory_space<vmem>>, vector<20x8xf32>
      tpu.vector_store %arg8[%c0_293, %c0_294], %452 {strides = array<i32>} : memref<20x8xf32, #tpu.memory_space<vmem>>, vector<20x8xf32>,
    } else {
    }
    %c0 = arith.constant 0 : index
    %c0_1 = arith.constant 0 : index
    %3 = vector.load %arg2[%c0, %c0_1] : memref<8x32xf32, #tpu.memory_space<vmem>>, vector<8x32xf32>
    %c0_2 = arith.constant 0 : index
    %c0_3 = arith.constant 0 : index
    %4 = vector.load %arg3[%c0_2, %c0_3] : memref<32x8xf32, #tpu.memory_space<vmem>>, vector<32x8xf32>
    %cst = arith.constant dense<0.000000e+00> : vector<8x8xf32>
    %5 = tpu.matmul %3, %4, %cst {dimension_numbers = #tpu.dot_dimension_numbers<[1], [0], [0], [1], [0, 0, 1, 1], [], []>} : vector<8x32xf32>, vector<32x8xf32>, vector<8x8xf32> -> vector<8x8xf32>
    %c0_4 = arith.constant 0 : index
    %c0_5 = arith.constant 0 : index
    %6 = vector.load %arg4[%c0_4, %c0_5] : memref<8x1xi32, #tpu.memory_space<vmem>>, vector<8x1xi32>
    %c0_6 = arith.constant 0 : index
    %c0_7 = arith.constant 0 : index
    %7 = vector.load %arg5[%c0_6, %c0_7] : memref<1x8xi32, #tpu.memory_space<vmem>>, vector<1x8xi32>
    %8 = vector.broadcast %6 : vector<8x1xi32> to vector<8x8xi32>
    %9 = vector.broadcast %7 : vector<1x8xi32> to vector<8x8xi32>
    %10 = arith.cmpi eq, %8, %9 : vector<8x8xi32>
    %11 = arith.extui %10 : vector<8x8xi1> to vector<8x8xi32>
    %12 = arith.sitofp %11 : vector<8x8xi32> to vector<8x8xf32>
    %cst_8 = arith.constant 9.500000e+00 : f32
    %13 = vector.broadcast %cst_8 : f32 to vector<8x8xf32>
    %14 = arith.mulf %5, %13 : vector<8x8xf32>
    %cst_9 = arith.constant -8.500000e+00 : f32
    %15 = vector.broadcast %cst_9 : f32 to vector<8x8xf32>
    %16 = arith.addf %14, %15 : vector<8x8xf32>
    %cst_10 = arith.constant 0.000000e+00 : f32
    %cst_11 = arith.constant 1.000000e+00 : f32
    %17 = vector.broadcast %cst_10 : f32 to vector<8x8xf32>
    %18 = arith.maximumf %17, %16 : vector<8x8xf32>
    %19 = vector.broadcast %cst_11 : f32 to vector<8x8xf32>
    %20 = arith.minimumf %19, %18 : vector<8x8xf32>
    %c0_12 = arith.constant 0 : index
    %c0_13 = arith.constant 0 : index
    %21 = vector.load %arg7[%c0_12, %c0_13] : memref<20x8xf32, #tpu.memory_space<vmem>>, vector<1x8xf32>
    %cst_14 = arith.constant dense<0.000000e+00> : vector<8xf32>
    %22 = vector.multi_reduction <add>, %20, %cst_14 [0] : vector<8x8xf32> to vector<8xf32>
    %23 = vector.shape_cast %22 : vector<8xf32> to vector<1x8xf32>
    %24 = arith.addf %21, %23 : vector<1x8xf32>
    %c0_15 = arith.constant 0 : index
    %c0_16 = arith.constant 0 : index
    %25 = vector.load %arg7[%c0_15, %c0_16] : memref<20x8xf32, #tpu.memory_space<vmem>>, vector<1x8xf32>
    tpu.vector_store %arg7[%c0_15, %c0_16], %24 {strides = array<i32>} : memref<20x8xf32, #tpu.memory_space<vmem>>, vector<1x8xf32>,
    %c0_17 = arith.constant 0 : index
    %c0_18 = arith.constant 0 : index
    %26 = vector.load %arg8[%c0_17, %c0_18] : memref<20x8xf32, #tpu.memory_space<vmem>>, vector<1x8xf32>
    %27 = arith.mulf %20, %12 : vector<8x8xf32>
    %cst_19 = arith.constant dense<0.000000e+00> : vector<8xf32>
    %28 = vector.multi_reduction <add>, %27, %cst_19 [0] : vector<8x8xf32> to vector<8xf32>
    %29 = vector.shape_cast %28 : vector<8xf32> to vector<1x8xf32>
    %30 = arith.addf %26, %29 : vector<1x8xf32>
    %c0_20 = arith.constant 0 : index
    %c0_21 = arith.constant 0 : index
    %31 = vector.load %arg8[%c0_20, %c0_21] : memref<20x8xf32, #tpu.memory_space<vmem>>, vector<1x8xf32>
    tpu.vector_store %arg8[%c0_20, %c0_21], %30 {strides = array<i32>} : memref<20x8xf32, #tpu.memory_space<vmem>>, vector<1x8xf32>,
    %cst_22 = arith.constant -9.500000e+00 : f32
    %32 = vector.broadcast %cst_22 : f32 to vector<8x8xf32>
    %33 = arith.mulf %5, %32 : vector<8x8xf32>
    %cst_23 = arith.constant 9.500000e+00 : f32
    %34 = vector.broadcast %cst_23 : f32 to vector<8x8xf32>
    %35 = arith.addf %33, %34 : vector<8x8xf32>
    %cst_24 = arith.constant 9.500000e+00 : f32
    %36 = vector.broadcast %cst_24 : f32 to vector<8x8xf32>
    %37 = arith.mulf %5, %36 : vector<8x8xf32>
    %cst_25 = arith.constant -7.500000e+00 : f32
    %38 = vector.broadcast %cst_25 : f32 to vector<8x8xf32>
    %39 = arith.addf %37, %38 : vector<8x8xf32>
    %40 = arith.minimumf %35, %39 : vector<8x8xf32>
    %cst_26 = arith.constant 0.000000e+00 : f32
    %41 = vector.broadcast %cst_26 : f32 to vector<8x8xf32>
    %42 = arith.maximumf %40, %41 : vector<8x8xf32>
    %c1 = arith.constant 1 : index
    %c0_27 = arith.constant 0 : index
    %43 = vector.load %arg7[%c1, %c0_27] : memref<20x8xf32, #tpu.memory_space<vmem>>, vector<1x8xf32>
    %cst_28 = arith.constant dense<0.000000e+00> : vector<8xf32>
    %44 = vector.multi_reduction <add>, %42, %cst_28 [0] : vector<8x8xf32> to vector<8xf32>
    %45 = vector.shape_cast %44 : vector<8xf32> to vector<1x8xf32>
    %46 = arith.addf %43, %45 : vector<1x8xf32>
    %c1_29 = arith.constant 1 : index
    %c0_30 = arith.constant 0 : index
    %47 = vector.load %arg7[%c1_29, %c0_30] : memref<20x8xf32, #tpu.memory_space<vmem>>, vector<1x8xf32>
    tpu.vector_store %arg7[%c1_29, %c0_30], %46 {strides = array<i32>} : memref<20x8xf32, #tpu.memory_space<vmem>>, vector<1x8xf32>,
    %c1_31 = arith.constant 1 : index
    %c0_32 = arith.constant 0 : index
    %48 = vector.load %arg8[%c1_31, %c0_32] : memref<20x8xf32, #tpu.memory_space<vmem>>, vector<1x8xf32>
    %49 = arith.mulf %42, %12 : vector<8x8xf32>
    %cst_33 = arith.constant dense<0.000000e+00> : vector<8xf32>
    %50 = vector.multi_reduction <add>, %49, %cst_33 [0] : vector<8x8xf32> to vector<8xf32>
    %51 = vector.shape_cast %50 : vector<8xf32> to vector<1x8xf32>
    %52 = arith.addf %48, %51 : vector<1x8xf32>
    %c1_34 = arith.constant 1 : index
    %c0_35 = arith.constant 0 : index
    %53 = vector.load %arg8[%c1_34, %c0_35] : memref<20x8xf32, #tpu.memory_space<vmem>>, vector<1x8xf32>
    tpu.vector_store %arg8[%c1_34, %c0_35], %52 {strides = array<i32>} : memref<20x8xf32, #tpu.memory_space<vmem>>, vector<1x8xf32>,
    %cst_36 = arith.constant -9.500000e+00 : f32
    %54 = vector.broadcast %cst_36 : f32 to vector<8x8xf32>
    %55 = arith.mulf %5, %54 : vector<8x8xf32>
    %cst_37 = arith.constant 8.500000e+00 : f32
    %56 = vector.broadcast %cst_37 : f32 to vector<8x8xf32>
    %57 = arith.addf %55, %56 : vector<8x8xf32>
    %cst_38 = arith.constant 9.500000e+00 : f32
    %58 = vector.broadcast %cst_38 : f32 to vector<8x8xf32>
    %59 = arith.mulf %5, %58 : vector<8x8xf32>
    %cst_39 = arith.constant -6.500000e+00 : f32
    %60 = vector.broadcast %cst_39 : f32 to vector<8x8xf32>
    %61 = arith.addf %59, %60 : vector<8x8xf32>
    %62 = arith.minimumf %57, %61 : vector<8x8xf32>
    %cst_40 = arith.constant 0.000000e+00 : f32
    %63 = vector.broadcast %cst_40 : f32 to vector<8x8xf32>
    %64 = arith.maximumf %62, %63 : vector<8x8xf32>
    %c2 = arith.constant 2 : index
    %c0_41 = arith.constant 0 : index
    %65 = vector.load %arg7[%c2, %c0_41] : memref<20x8xf32, #tpu.memory_space<vmem>>, vector<1x8xf32>
    %cst_42 = arith.constant dense<0.000000e+00> : vector<8xf32>
    %66 = vector.multi_reduction <add>, %64, %cst_42 [0] : vector<8x8xf32> to vector<8xf32>
    %67 = vector.shape_cast %66 : vector<8xf32> to vector<1x8xf32>
    %68 = arith.addf %65, %67 : vector<1x8xf32>
    %c2_43 = arith.constant 2 : index
    %c0_44 = arith.constant 0 : index
    %69 = vector.load %arg7[%c2_43, %c0_44] : memref<20x8xf32, #tpu.memory_space<vmem>>, vector<1x8xf32>
    tpu.vector_store %arg7[%c2_43, %c0_44], %68 {strides = array<i32>} : memref<20x8xf32, #tpu.memory_space<vmem>>, vector<1x8xf32>,
    %c2_45 = arith.constant 2 : index
    %c0_46 = arith.constant 0 : index
    %70 = vector.load %arg8[%c2_45, %c0_46] : memref<20x8xf32, #tpu.memory_space<vmem>>, vector<1x8xf32>
    %71 = arith.mulf %64, %12 : vector<8x8xf32>
    %cst_47 = arith.constant dense<0.000000e+00> : vector<8xf32>
    %72 = vector.multi_reduction <add>, %71, %cst_47 [0] : vector<8x8xf32> to vector<8xf32>
    %73 = vector.shape_cast %72 : vector<8xf32> to vector<1x8xf32>
    %74 = arith.addf %70, %73 : vector<1x8xf32>
    %c2_48 = arith.constant 2 : index
    %c0_49 = arith.constant 0 : index
    %75 = vector.load %arg8[%c2_48, %c0_49] : memref<20x8xf32, #tpu.memory_space<vmem>>, vector<1x8xf32>
    tpu.vector_store %arg8[%c2_48, %c0_49], %74 {strides = array<i32>} : memref<20x8xf32, #tpu.memory_space<vmem>>, vector<1x8xf32>,
    %cst_50 = arith.constant -9.500000e+00 : f32
    %76 = vector.broadcast %cst_50 : f32 to vector<8x8xf32>
    %77 = arith.mulf %5, %76 : vector<8x8xf32>
    %cst_51 = arith.constant 7.500000e+00 : f32
    %78 = vector.broadcast %cst_51 : f32 to vector<8x8xf32>
    %79 = arith.addf %77, %78 : vector<8x8xf32>
    %cst_52 = arith.constant 9.500000e+00 : f32
    %80 = vector.broadcast %cst_52 : f32 to vector<8x8xf32>
    %81 = arith.mulf %5, %80 : vector<8x8xf32>
    %cst_53 = arith.constant -5.500000e+00 : f32
    %82 = vector.broadcast %cst_53 : f32 to vector<8x8xf32>
    %83 = arith.addf %81, %82 : vector<8x8xf32>
    %84 = arith.minimumf %79, %83 : vector<8x8xf32>
    %cst_54 = arith.constant 0.000000e+00 : f32
    %85 = vector.broadcast %cst_54 : f32 to vector<8x8xf32>
    %86 = arith.maximumf %84, %85 : vector<8x8xf32>
    %c3 = arith.constant 3 : index
    %c0_55 = arith.constant 0 : index
    %87 = vector.load %arg7[%c3, %c0_55] : memref<20x8xf32, #tpu.memory_space<vmem>>, vector<1x8xf32>
    %cst_56 = arith.constant dense<0.000000e+00> : vector<8xf32>
    %88 = vector.multi_reduction <add>, %86, %cst_56 [0] : vector<8x8xf32> to vector<8xf32>
    %89 = vector.shape_cast %88 : vector<8xf32> to vector<1x8xf32>
    %90 = arith.addf %87, %89 : vector<1x8xf32>
    %c3_57 = arith.constant 3 : index
    %c0_58 = arith.constant 0 : index
    %91 = vector.load %arg7[%c3_57, %c0_58] : memref<20x8xf32, #tpu.memory_space<vmem>>, vector<1x8xf32>
    tpu.vector_store %arg7[%c3_57, %c0_58], %90 {strides = array<i32>} : memref<20x8xf32, #tpu.memory_space<vmem>>, vector<1x8xf32>,
    %c3_59 = arith.constant 3 : index
    %c0_60 = arith.constant 0 : index
    %92 = vector.load %arg8[%c3_59, %c0_60] : memref<20x8xf32, #tpu.memory_space<vmem>>, vector<1x8xf32>
    %93 = arith.mulf %86, %12 : vector<8x8xf32>
    %cst_61 = arith.constant dense<0.000000e+00> : vector<8xf32>
    %94 = vector.multi_reduction <add>, %93, %cst_61 [0] : vector<8x8xf32> to vector<8xf32>
    %95 = vector.shape_cast %94 : vector<8xf32> to vector<1x8xf32>
    %96 = arith.addf %92, %95 : vector<1x8xf32>
    %c3_62 = arith.constant 3 : index
    %c0_63 = arith.constant 0 : index
    %97 = vector.load %arg8[%c3_62, %c0_63] : memref<20x8xf32, #tpu.memory_space<vmem>>, vector<1x8xf32>
    tpu.vector_store %arg8[%c3_62, %c0_63], %96 {strides = array<i32>} : memref<20x8xf32, #tpu.memory_space<vmem>>, vector<1x8xf32>,
    %cst_64 = arith.constant -9.500000e+00 : f32
    %98 = vector.broadcast %cst_64 : f32 to vector<8x8xf32>
    %99 = arith.mulf %5, %98 : vector<8x8xf32>
    %cst_65 = arith.constant 6.500000e+00 : f32
    %100 = vector.broadcast %cst_65 : f32 to vector<8x8xf32>
    %101 = arith.addf %99, %100 : vector<8x8xf32>
    %cst_66 = arith.constant 9.500000e+00 : f32
    %102 = vector.broadcast %cst_66 : f32 to vector<8x8xf32>
    %103 = arith.mulf %5, %102 : vector<8x8xf32>
    %cst_67 = arith.constant -4.500000e+00 : f32
    %104 = vector.broadcast %cst_67 : f32 to vector<8x8xf32>
    %105 = arith.addf %103, %104 : vector<8x8xf32>
    %106 = arith.minimumf %101, %105 : vector<8x8xf32>
    %cst_68 = arith.constant 0.000000e+00 : f32
    %107 = vector.broadcast %cst_68 : f32 to vector<8x8xf32>
    %108 = arith.maximumf %106, %107 : vector<8x8xf32>
    %c4 = arith.constant 4 : index
    %c0_69 = arith.constant 0 : index
    %109 = vector.load %arg7[%c4, %c0_69] : memref<20x8xf32, #tpu.memory_space<vmem>>, vector<1x8xf32>
    %cst_70 = arith.constant dense<0.000000e+00> : vector<8xf32>
    %110 = vector.multi_reduction <add>, %108, %cst_70 [0] : vector<8x8xf32> to vector<8xf32>
    %111 = vector.shape_cast %110 : vector<8xf32> to vector<1x8xf32>
    %112 = arith.addf %109, %111 : vector<1x8xf32>
    %c4_71 = arith.constant 4 : index
    %c0_72 = arith.constant 0 : index
    %113 = vector.load %arg7[%c4_71, %c0_72] : memref<20x8xf32, #tpu.memory_space<vmem>>, vector<1x8xf32>
    tpu.vector_store %arg7[%c4_71, %c0_72], %112 {strides = array<i32>} : memref<20x8xf32, #tpu.memory_space<vmem>>, vector<1x8xf32>,
    %c4_73 = arith.constant 4 : index
    %c0_74 = arith.constant 0 : index
    %114 = vector.load %arg8[%c4_73, %c0_74] : memref<20x8xf32, #tpu.memory_space<vmem>>, vector<1x8xf32>
    %115 = arith.mulf %108, %12 : vector<8x8xf32>
    %cst_75 = arith.constant dense<0.000000e+00> : vector<8xf32>
    %116 = vector.multi_reduction <add>, %115, %cst_75 [0] : vector<8x8xf32> to vector<8xf32>
    %117 = vector.shape_cast %116 : vector<8xf32> to vector<1x8xf32>
    %118 = arith.addf %114, %117 : vector<1x8xf32>
    %c4_76 = arith.constant 4 : index
    %c0_77 = arith.constant 0 : index
    %119 = vector.load %arg8[%c4_76, %c0_77] : memref<20x8xf32, #tpu.memory_space<vmem>>, vector<1x8xf32>
    tpu.vector_store %arg8[%c4_76, %c0_77], %118 {strides = array<i32>} : memref<20x8xf32, #tpu.memory_space<vmem>>, vector<1x8xf32>,
    %cst_78 = arith.constant -9.500000e+00 : f32
    %120 = vector.broadcast %cst_78 : f32 to vector<8x8xf32>
    %121 = arith.mulf %5, %120 : vector<8x8xf32>
    %cst_79 = arith.constant 5.500000e+00 : f32
    %122 = vector.broadcast %cst_79 : f32 to vector<8x8xf32>
    %123 = arith.addf %121, %122 : vector<8x8xf32>
    %cst_80 = arith.constant 9.500000e+00 : f32
    %124 = vector.broadcast %cst_80 : f32 to vector<8x8xf32>
    %125 = arith.mulf %5, %124 : vector<8x8xf32>
    %cst_81 = arith.constant -3.500000e+00 : f32
    %126 = vector.broadcast %cst_81 : f32 to vector<8x8xf32>
    %127 = arith.addf %125, %126 : vector<8x8xf32>
    %128 = arith.minimumf %123, %127 : vector<8x8xf32>
    %cst_82 = arith.constant 0.000000e+00 : f32
    %129 = vector.broadcast %cst_82 : f32 to vector<8x8xf32>
    %130 = arith.maximumf %128, %129 : vector<8x8xf32>
    %c5 = arith.constant 5 : index
    %c0_83 = arith.constant 0 : index
    %131 = vector.load %arg7[%c5, %c0_83] : memref<20x8xf32, #tpu.memory_space<vmem>>, vector<1x8xf32>
    %cst_84 = arith.constant dense<0.000000e+00> : vector<8xf32>
    %132 = vector.multi_reduction <add>, %130, %cst_84 [0] : vector<8x8xf32> to vector<8xf32>
    %133 = vector.shape_cast %132 : vector<8xf32> to vector<1x8xf32>
    %134 = arith.addf %131, %133 : vector<1x8xf32>
    %c5_85 = arith.constant 5 : index
    %c0_86 = arith.constant 0 : index
    %135 = vector.load %arg7[%c5_85, %c0_86] : memref<20x8xf32, #tpu.memory_space<vmem>>, vector<1x8xf32>
    tpu.vector_store %arg7[%c5_85, %c0_86], %134 {strides = array<i32>} : memref<20x8xf32, #tpu.memory_space<vmem>>, vector<1x8xf32>,
    %c5_87 = arith.constant 5 : index
    %c0_88 = arith.constant 0 : index
    %136 = vector.load %arg8[%c5_87, %c0_88] : memref<20x8xf32, #tpu.memory_space<vmem>>, vector<1x8xf32>
    %137 = arith.mulf %130, %12 : vector<8x8xf32>
    %cst_89 = arith.constant dense<0.000000e+00> : vector<8xf32>
    %138 = vector.multi_reduction <add>, %137, %cst_89 [0] : vector<8x8xf32> to vector<8xf32>
    %139 = vector.shape_cast %138 : vector<8xf32> to vector<1x8xf32>
    %140 = arith.addf %136, %139 : vector<1x8xf32>
    %c5_90 = arith.constant 5 : index
    %c0_91 = arith.constant 0 : index
    %141 = vector.load %arg8[%c5_90, %c0_91] : memref<20x8xf32, #tpu.memory_space<vmem>>, vector<1x8xf32>
    tpu.vector_store %arg8[%c5_90, %c0_91], %140 {strides = array<i32>} : memref<20x8xf32, #tpu.memory_space<vmem>>, vector<1x8xf32>,
    %cst_92 = arith.constant -9.500000e+00 : f32
    %142 = vector.broadcast %cst_92 : f32 to vector<8x8xf32>
    %143 = arith.mulf %5, %142 : vector<8x8xf32>
    %cst_93 = arith.constant 4.500000e+00 : f32
    %144 = vector.broadcast %cst_93 : f32 to vector<8x8xf32>
    %145 = arith.addf %143, %144 : vector<8x8xf32>
    %cst_94 = arith.constant 9.500000e+00 : f32
    %146 = vector.broadcast %cst_94 : f32 to vector<8x8xf32>
    %147 = arith.mulf %5, %146 : vector<8x8xf32>
    %cst_95 = arith.constant -2.500000e+00 : f32
    %148 = vector.broadcast %cst_95 : f32 to vector<8x8xf32>
    %149 = arith.addf %147, %148 : vector<8x8xf32>
    %150 = arith.minimumf %145, %149 : vector<8x8xf32>
    %cst_96 = arith.constant 0.000000e+00 : f32
    %151 = vector.broadcast %cst_96 : f32 to vector<8x8xf32>
    %152 = arith.maximumf %150, %151 : vector<8x8xf32>
    %c6 = arith.constant 6 : index
    %c0_97 = arith.constant 0 : index
    %153 = vector.load %arg7[%c6, %c0_97] : memref<20x8xf32, #tpu.memory_space<vmem>>, vector<1x8xf32>
    %cst_98 = arith.constant dense<0.000000e+00> : vector<8xf32>
    %154 = vector.multi_reduction <add>, %152, %cst_98 [0] : vector<8x8xf32> to vector<8xf32>
    %155 = vector.shape_cast %154 : vector<8xf32> to vector<1x8xf32>
    %156 = arith.addf %153, %155 : vector<1x8xf32>
    %c6_99 = arith.constant 6 : index
    %c0_100 = arith.constant 0 : index
    %157 = vector.load %arg7[%c6_99, %c0_100] : memref<20x8xf32, #tpu.memory_space<vmem>>, vector<1x8xf32>
    tpu.vector_store %arg7[%c6_99, %c0_100], %156 {strides = array<i32>} : memref<20x8xf32, #tpu.memory_space<vmem>>, vector<1x8xf32>,
    %c6_101 = arith.constant 6 : index
    %c0_102 = arith.constant 0 : index
    %158 = vector.load %arg8[%c6_101, %c0_102] : memref<20x8xf32, #tpu.memory_space<vmem>>, vector<1x8xf32>
    %159 = arith.mulf %152, %12 : vector<8x8xf32>
    %cst_103 = arith.constant dense<0.000000e+00> : vector<8xf32>
    %160 = vector.multi_reduction <add>, %159, %cst_103 [0] : vector<8x8xf32> to vector<8xf32>
    %161 = vector.shape_cast %160 : vector<8xf32> to vector<1x8xf32>
    %162 = arith.addf %158, %161 : vector<1x8xf32>
    %c6_104 = arith.constant 6 : index
    %c0_105 = arith.constant 0 : index
    %163 = vector.load %arg8[%c6_104, %c0_105] : memref<20x8xf32, #tpu.memory_space<vmem>>, vector<1x8xf32>
    tpu.vector_store %arg8[%c6_104, %c0_105], %162 {strides = array<i32>} : memref<20x8xf32, #tpu.memory_space<vmem>>, vector<1x8xf32>,
    %cst_106 = arith.constant -9.500000e+00 : f32
    %164 = vector.broadcast %cst_106 : f32 to vector<8x8xf32>
    %165 = arith.mulf %5, %164 : vector<8x8xf32>
    %cst_107 = arith.constant 3.500000e+00 : f32
    %166 = vector.broadcast %cst_107 : f32 to vector<8x8xf32>
    %167 = arith.addf %165, %166 : vector<8x8xf32>
    %cst_108 = arith.constant 9.500000e+00 : f32
    %168 = vector.broadcast %cst_108 : f32 to vector<8x8xf32>
    %169 = arith.mulf %5, %168 : vector<8x8xf32>
    %cst_109 = arith.constant -1.500000e+00 : f32
    %170 = vector.broadcast %cst_109 : f32 to vector<8x8xf32>
    %171 = arith.addf %169, %170 : vector<8x8xf32>
    %172 = arith.minimumf %167, %171 : vector<8x8xf32>
    %cst_110 = arith.constant 0.000000e+00 : f32
    %173 = vector.broadcast %cst_110 : f32 to vector<8x8xf32>
    %174 = arith.maximumf %172, %173 : vector<8x8xf32>
    %c7 = arith.constant 7 : index
    %c0_111 = arith.constant 0 : index
    %175 = vector.load %arg7[%c7, %c0_111] : memref<20x8xf32, #tpu.memory_space<vmem>>, vector<1x8xf32>
    %cst_112 = arith.constant dense<0.000000e+00> : vector<8xf32>
    %176 = vector.multi_reduction <add>, %174, %cst_112 [0] : vector<8x8xf32> to vector<8xf32>
    %177 = vector.shape_cast %176 : vector<8xf32> to vector<1x8xf32>
    %178 = arith.addf %175, %177 : vector<1x8xf32>
    %c7_113 = arith.constant 7 : index
    %c0_114 = arith.constant 0 : index
    %179 = vector.load %arg7[%c7_113, %c0_114] : memref<20x8xf32, #tpu.memory_space<vmem>>, vector<1x8xf32>
    tpu.vector_store %arg7[%c7_113, %c0_114], %178 {strides = array<i32>} : memref<20x8xf32, #tpu.memory_space<vmem>>, vector<1x8xf32>,
    %c7_115 = arith.constant 7 : index
    %c0_116 = arith.constant 0 : index
    %180 = vector.load %arg8[%c7_115, %c0_116] : memref<20x8xf32, #tpu.memory_space<vmem>>, vector<1x8xf32>
    %181 = arith.mulf %174, %12 : vector<8x8xf32>
    %cst_117 = arith.constant dense<0.000000e+00> : vector<8xf32>
    %182 = vector.multi_reduction <add>, %181, %cst_117 [0] : vector<8x8xf32> to vector<8xf32>
    %183 = vector.shape_cast %182 : vector<8xf32> to vector<1x8xf32>
    %184 = arith.addf %180, %183 : vector<1x8xf32>
    %c7_118 = arith.constant 7 : index
    %c0_119 = arith.constant 0 : index
    %185 = vector.load %arg8[%c7_118, %c0_119] : memref<20x8xf32, #tpu.memory_space<vmem>>, vector<1x8xf32>
    tpu.vector_store %arg8[%c7_118, %c0_119], %184 {strides = array<i32>} : memref<20x8xf32, #tpu.memory_space<vmem>>, vector<1x8xf32>,
    %cst_120 = arith.constant -9.500000e+00 : f32
    %186 = vector.broadcast %cst_120 : f32 to vector<8x8xf32>
    %187 = arith.mulf %5, %186 : vector<8x8xf32>
    %cst_121 = arith.constant 2.500000e+00 : f32
    %188 = vector.broadcast %cst_121 : f32 to vector<8x8xf32>
    %189 = arith.addf %187, %188 : vector<8x8xf32>
    %cst_122 = arith.constant 9.500000e+00 : f32
    %190 = vector.broadcast %cst_122 : f32 to vector<8x8xf32>
    %191 = arith.mulf %5, %190 : vector<8x8xf32>
    %cst_123 = arith.constant -5.000000e-01 : f32
    %192 = vector.broadcast %cst_123 : f32 to vector<8x8xf32>
    %193 = arith.addf %191, %192 : vector<8x8xf32>
    %194 = arith.minimumf %189, %193 : vector<8x8xf32>
    %cst_124 = arith.constant 0.000000e+00 : f32
    %195 = vector.broadcast %cst_124 : f32 to vector<8x8xf32>
    %196 = arith.maximumf %194, %195 : vector<8x8xf32>
    %c8 = arith.constant 8 : index
    %c0_125 = arith.constant 0 : index
    %197 = vector.load %arg7[%c8, %c0_125] : memref<20x8xf32, #tpu.memory_space<vmem>>, vector<1x8xf32>
    %cst_126 = arith.constant dense<0.000000e+00> : vector<8xf32>
    %198 = vector.multi_reduction <add>, %196, %cst_126 [0] : vector<8x8xf32> to vector<8xf32>
    %199 = vector.shape_cast %198 : vector<8xf32> to vector<1x8xf32>
    %200 = arith.addf %197, %199 : vector<1x8xf32>
    %c8_127 = arith.constant 8 : index
    %c0_128 = arith.constant 0 : index
    %201 = vector.load %arg7[%c8_127, %c0_128] : memref<20x8xf32, #tpu.memory_space<vmem>>, vector<1x8xf32>
    tpu.vector_store %arg7[%c8_127, %c0_128], %200 {strides = array<i32>} : memref<20x8xf32, #tpu.memory_space<vmem>>, vector<1x8xf32>,
    %c8_129 = arith.constant 8 : index
    %c0_130 = arith.constant 0 : index
    %202 = vector.load %arg8[%c8_129, %c0_130] : memref<20x8xf32, #tpu.memory_space<vmem>>, vector<1x8xf32>
    %203 = arith.mulf %196, %12 : vector<8x8xf32>
    %cst_131 = arith.constant dense<0.000000e+00> : vector<8xf32>
    %204 = vector.multi_reduction <add>, %203, %cst_131 [0] : vector<8x8xf32> to vector<8xf32>
    %205 = vector.shape_cast %204 : vector<8xf32> to vector<1x8xf32>
    %206 = arith.addf %202, %205 : vector<1x8xf32>
    %c8_132 = arith.constant 8 : index
    %c0_133 = arith.constant 0 : index
    %207 = vector.load %arg8[%c8_132, %c0_133] : memref<20x8xf32, #tpu.memory_space<vmem>>, vector<1x8xf32>
    tpu.vector_store %arg8[%c8_132, %c0_133], %206 {strides = array<i32>} : memref<20x8xf32, #tpu.memory_space<vmem>>, vector<1x8xf32>,
    %cst_134 = arith.constant -9.500000e+00 : f32
    %208 = vector.broadcast %cst_134 : f32 to vector<8x8xf32>
    %209 = arith.mulf %5, %208 : vector<8x8xf32>
    %cst_135 = arith.constant 1.500000e+00 : f32
    %210 = vector.broadcast %cst_135 : f32 to vector<8x8xf32>
    %211 = arith.addf %209, %210 : vector<8x8xf32>
    %cst_136 = arith.constant 9.500000e+00 : f32
    %212 = vector.broadcast %cst_136 : f32 to vector<8x8xf32>
    %213 = arith.mulf %5, %212 : vector<8x8xf32>
    %cst_137 = arith.constant 5.000000e-01 : f32
    %214 = vector.broadcast %cst_137 : f32 to vector<8x8xf32>
    %215 = arith.addf %213, %214 : vector<8x8xf32>
    %216 = arith.minimumf %211, %215 : vector<8x8xf32>
    %cst_138 = arith.constant 0.000000e+00 : f32
    %217 = vector.broadcast %cst_138 : f32 to vector<8x8xf32>
    %218 = arith.maximumf %216, %217 : vector<8x8xf32>
    %c9 = arith.constant 9 : index
    %c0_139 = arith.constant 0 : index
    %219 = vector.load %arg7[%c9, %c0_139] : memref<20x8xf32, #tpu.memory_space<vmem>>, vector<1x8xf32>
    %cst_140 = arith.constant dense<0.000000e+00> : vector<8xf32>
    %220 = vector.multi_reduction <add>, %218, %cst_140 [0] : vector<8x8xf32> to vector<8xf32>
    %221 = vector.shape_cast %220 : vector<8xf32> to vector<1x8xf32>
    %222 = arith.addf %219, %221 : vector<1x8xf32>
    %c9_141 = arith.constant 9 : index
    %c0_142 = arith.constant 0 : index
    %223 = vector.load %arg7[%c9_141, %c0_142] : memref<20x8xf32, #tpu.memory_space<vmem>>, vector<1x8xf32>
    tpu.vector_store %arg7[%c9_141, %c0_142], %222 {strides = array<i32>} : memref<20x8xf32, #tpu.memory_space<vmem>>, vector<1x8xf32>,
    %c9_143 = arith.constant 9 : index
    %c0_144 = arith.constant 0 : index
    %224 = vector.load %arg8[%c9_143, %c0_144] : memref<20x8xf32, #tpu.memory_space<vmem>>, vector<1x8xf32>
    %225 = arith.mulf %218, %12 : vector<8x8xf32>
    %cst_145 = arith.constant dense<0.000000e+00> : vector<8xf32>
    %226 = vector.multi_reduction <add>, %225, %cst_145 [0] : vector<8x8xf32> to vector<8xf32>
    %227 = vector.shape_cast %226 : vector<8xf32> to vector<1x8xf32>
    %228 = arith.addf %224, %227 : vector<1x8xf32>
    %c9_146 = arith.constant 9 : index
    %c0_147 = arith.constant 0 : index
    %229 = vector.load %arg8[%c9_146, %c0_147] : memref<20x8xf32, #tpu.memory_space<vmem>>, vector<1x8xf32>
    tpu.vector_store %arg8[%c9_146, %c0_147], %228 {strides = array<i32>} : memref<20x8xf32, #tpu.memory_space<vmem>>, vector<1x8xf32>,
    %cst_148 = arith.constant -9.500000e+00 : f32
    %230 = vector.broadcast %cst_148 : f32 to vector<8x8xf32>
    %231 = arith.mulf %5, %230 : vector<8x8xf32>
    %cst_149 = arith.constant 5.000000e-01 : f32
    %232 = vector.broadcast %cst_149 : f32 to vector<8x8xf32>
    %233 = arith.addf %231, %232 : vector<8x8xf32>
    %cst_150 = arith.constant 9.500000e+00 : f32
    %234 = vector.broadcast %cst_150 : f32 to vector<8x8xf32>
    %235 = arith.mulf %5, %234 : vector<8x8xf32>
    %cst_151 = arith.constant 1.500000e+00 : f32
    %236 = vector.broadcast %cst_151 : f32 to vector<8x8xf32>
    %237 = arith.addf %235, %236 : vector<8x8xf32>
    %238 = arith.minimumf %233, %237 : vector<8x8xf32>
    %cst_152 = arith.constant 0.000000e+00 : f32
    %239 = vector.broadcast %cst_152 : f32 to vector<8x8xf32>
    %240 = arith.maximumf %238, %239 : vector<8x8xf32>
    %c10 = arith.constant 10 : index
    %c0_153 = arith.constant 0 : index
    %241 = vector.load %arg7[%c10, %c0_153] : memref<20x8xf32, #tpu.memory_space<vmem>>, vector<1x8xf32>
    %cst_154 = arith.constant dense<0.000000e+00> : vector<8xf32>
    %242 = vector.multi_reduction <add>, %240, %cst_154 [0] : vector<8x8xf32> to vector<8xf32>
    %243 = vector.shape_cast %242 : vector<8xf32> to vector<1x8xf32>
    %244 = arith.addf %241, %243 : vector<1x8xf32>
    %c10_155 = arith.constant 10 : index
    %c0_156 = arith.constant 0 : index
    %245 = vector.load %arg7[%c10_155, %c0_156] : memref<20x8xf32, #tpu.memory_space<vmem>>, vector<1x8xf32>
    tpu.vector_store %arg7[%c10_155, %c0_156], %244 {strides = array<i32>} : memref<20x8xf32, #tpu.memory_space<vmem>>, vector<1x8xf32>,
    %c10_157 = arith.constant 10 : index
    %c0_158 = arith.constant 0 : index
    %246 = vector.load %arg8[%c10_157, %c0_158] : memref<20x8xf32, #tpu.memory_space<vmem>>, vector<1x8xf32>
    %247 = arith.mulf %240, %12 : vector<8x8xf32>
    %cst_159 = arith.constant dense<0.000000e+00> : vector<8xf32>
    %248 = vector.multi_reduction <add>, %247, %cst_159 [0] : vector<8x8xf32> to vector<8xf32>
    %249 = vector.shape_cast %248 : vector<8xf32> to vector<1x8xf32>
    %250 = arith.addf %246, %249 : vector<1x8xf32>
    %c10_160 = arith.constant 10 : index
    %c0_161 = arith.constant 0 : index
    %251 = vector.load %arg8[%c10_160, %c0_161] : memref<20x8xf32, #tpu.memory_space<vmem>>, vector<1x8xf32>
    tpu.vector_store %arg8[%c10_160, %c0_161], %250 {strides = array<i32>} : memref<20x8xf32, #tpu.memory_space<vmem>>, vector<1x8xf32>,
    %cst_162 = arith.constant -9.500000e+00 : f32
    %252 = vector.broadcast %cst_162 : f32 to vector<8x8xf32>
    %253 = arith.mulf %5, %252 : vector<8x8xf32>
    %cst_163 = arith.constant -5.000000e-01 : f32
    %254 = vector.broadcast %cst_163 : f32 to vector<8x8xf32>
    %255 = arith.addf %253, %254 : vector<8x8xf32>
    %cst_164 = arith.constant 9.500000e+00 : f32
    %256 = vector.broadcast %cst_164 : f32 to vector<8x8xf32>
    %257 = arith.mulf %5, %256 : vector<8x8xf32>
    %cst_165 = arith.constant 2.500000e+00 : f32
    %258 = vector.broadcast %cst_165 : f32 to vector<8x8xf32>
    %259 = arith.addf %257, %258 : vector<8x8xf32>
    %260 = arith.minimumf %255, %259 : vector<8x8xf32>
    %cst_166 = arith.constant 0.000000e+00 : f32
    %261 = vector.broadcast %cst_166 : f32 to vector<8x8xf32>
    %262 = arith.maximumf %260, %261 : vector<8x8xf32>
    %c11 = arith.constant 11 : index
    %c0_167 = arith.constant 0 : index
    %263 = vector.load %arg7[%c11, %c0_167] : memref<20x8xf32, #tpu.memory_space<vmem>>, vector<1x8xf32>
    %cst_168 = arith.constant dense<0.000000e+00> : vector<8xf32>
    %264 = vector.multi_reduction <add>, %262, %cst_168 [0] : vector<8x8xf32> to vector<8xf32>
    %265 = vector.shape_cast %264 : vector<8xf32> to vector<1x8xf32>
    %266 = arith.addf %263, %265 : vector<1x8xf32>
    %c11_169 = arith.constant 11 : index
    %c0_170 = arith.constant 0 : index
    %267 = vector.load %arg7[%c11_169, %c0_170] : memref<20x8xf32, #tpu.memory_space<vmem>>, vector<1x8xf32>
    tpu.vector_store %arg7[%c11_169, %c0_170], %266 {strides = array<i32>} : memref<20x8xf32, #tpu.memory_space<vmem>>, vector<1x8xf32>,
    %c11_171 = arith.constant 11 : index
    %c0_172 = arith.constant 0 : index
    %268 = vector.load %arg8[%c11_171, %c0_172] : memref<20x8xf32, #tpu.memory_space<vmem>>, vector<1x8xf32>
    %269 = arith.mulf %262, %12 : vector<8x8xf32>
    %cst_173 = arith.constant dense<0.000000e+00> : vector<8xf32>
    %270 = vector.multi_reduction <add>, %269, %cst_173 [0] : vector<8x8xf32> to vector<8xf32>
    %271 = vector.shape_cast %270 : vector<8xf32> to vector<1x8xf32>
    %272 = arith.addf %268, %271 : vector<1x8xf32>
    %c11_174 = arith.constant 11 : index
    %c0_175 = arith.constant 0 : index
    %273 = vector.load %arg8[%c11_174, %c0_175] : memref<20x8xf32, #tpu.memory_space<vmem>>, vector<1x8xf32>
    tpu.vector_store %arg8[%c11_174, %c0_175], %272 {strides = array<i32>} : memref<20x8xf32, #tpu.memory_space<vmem>>, vector<1x8xf32>,
    %cst_176 = arith.constant -9.500000e+00 : f32
    %274 = vector.broadcast %cst_176 : f32 to vector<8x8xf32>
    %275 = arith.mulf %5, %274 : vector<8x8xf32>
    %cst_177 = arith.constant -1.500000e+00 : f32
    %276 = vector.broadcast %cst_177 : f32 to vector<8x8xf32>
    %277 = arith.addf %275, %276 : vector<8x8xf32>
    %cst_178 = arith.constant 9.500000e+00 : f32
    %278 = vector.broadcast %cst_178 : f32 to vector<8x8xf32>
    %279 = arith.mulf %5, %278 : vector<8x8xf32>
    %cst_179 = arith.constant 3.500000e+00 : f32
    %280 = vector.broadcast %cst_179 : f32 to vector<8x8xf32>
    %281 = arith.addf %279, %280 : vector<8x8xf32>
    %282 = arith.minimumf %277, %281 : vector<8x8xf32>
    %cst_180 = arith.constant 0.000000e+00 : f32
    %283 = vector.broadcast %cst_180 : f32 to vector<8x8xf32>
    %284 = arith.maximumf %282, %283 : vector<8x8xf32>
    %c12 = arith.constant 12 : index
    %c0_181 = arith.constant 0 : index
    %285 = vector.load %arg7[%c12, %c0_181] : memref<20x8xf32, #tpu.memory_space<vmem>>, vector<1x8xf32>
    %cst_182 = arith.constant dense<0.000000e+00> : vector<8xf32>
    %286 = vector.multi_reduction <add>, %284, %cst_182 [0] : vector<8x8xf32> to vector<8xf32>
    %287 = vector.shape_cast %286 : vector<8xf32> to vector<1x8xf32>
    %288 = arith.addf %285, %287 : vector<1x8xf32>
    %c12_183 = arith.constant 12 : index
    %c0_184 = arith.constant 0 : index
    %289 = vector.load %arg7[%c12_183, %c0_184] : memref<20x8xf32, #tpu.memory_space<vmem>>, vector<1x8xf32>
    tpu.vector_store %arg7[%c12_183, %c0_184], %288 {strides = array<i32>} : memref<20x8xf32, #tpu.memory_space<vmem>>, vector<1x8xf32>,
    %c12_185 = arith.constant 12 : index
    %c0_186 = arith.constant 0 : index
    %290 = vector.load %arg8[%c12_185, %c0_186] : memref<20x8xf32, #tpu.memory_space<vmem>>, vector<1x8xf32>
    %291 = arith.mulf %284, %12 : vector<8x8xf32>
    %cst_187 = arith.constant dense<0.000000e+00> : vector<8xf32>
    %292 = vector.multi_reduction <add>, %291, %cst_187 [0] : vector<8x8xf32> to vector<8xf32>
    %293 = vector.shape_cast %292 : vector<8xf32> to vector<1x8xf32>
    %294 = arith.addf %290, %293 : vector<1x8xf32>
    %c12_188 = arith.constant 12 : index
    %c0_189 = arith.constant 0 : index
    %295 = vector.load %arg8[%c12_188, %c0_189] : memref<20x8xf32, #tpu.memory_space<vmem>>, vector<1x8xf32>
    tpu.vector_store %arg8[%c12_188, %c0_189], %294 {strides = array<i32>} : memref<20x8xf32, #tpu.memory_space<vmem>>, vector<1x8xf32>,
    %cst_190 = arith.constant -9.500000e+00 : f32
    %296 = vector.broadcast %cst_190 : f32 to vector<8x8xf32>
    %297 = arith.mulf %5, %296 : vector<8x8xf32>
    %cst_191 = arith.constant -2.500000e+00 : f32
    %298 = vector.broadcast %cst_191 : f32 to vector<8x8xf32>
    %299 = arith.addf %297, %298 : vector<8x8xf32>
    %cst_192 = arith.constant 9.500000e+00 : f32
    %300 = vector.broadcast %cst_192 : f32 to vector<8x8xf32>
    %301 = arith.mulf %5, %300 : vector<8x8xf32>
    %cst_193 = arith.constant 4.500000e+00 : f32
    %302 = vector.broadcast %cst_193 : f32 to vector<8x8xf32>
    %303 = arith.addf %301, %302 : vector<8x8xf32>
    %304 = arith.minimumf %299, %303 : vector<8x8xf32>
    %cst_194 = arith.constant 0.000000e+00 : f32
    %305 = vector.broadcast %cst_194 : f32 to vector<8x8xf32>
    %306 = arith.maximumf %304, %305 : vector<8x8xf32>
    %c13 = arith.constant 13 : index
    %c0_195 = arith.constant 0 : index
    %307 = vector.load %arg7[%c13, %c0_195] : memref<20x8xf32, #tpu.memory_space<vmem>>, vector<1x8xf32>
    %cst_196 = arith.constant dense<0.000000e+00> : vector<8xf32>
    %308 = vector.multi_reduction <add>, %306, %cst_196 [0] : vector<8x8xf32> to vector<8xf32>
    %309 = vector.shape_cast %308 : vector<8xf32> to vector<1x8xf32>
    %310 = arith.addf %307, %309 : vector<1x8xf32>
    %c13_197 = arith.constant 13 : index
    %c0_198 = arith.constant 0 : index
    %311 = vector.load %arg7[%c13_197, %c0_198] : memref<20x8xf32, #tpu.memory_space<vmem>>, vector<1x8xf32>
    tpu.vector_store %arg7[%c13_197, %c0_198], %310 {strides = array<i32>} : memref<20x8xf32, #tpu.memory_space<vmem>>, vector<1x8xf32>,
    %c13_199 = arith.constant 13 : index
    %c0_200 = arith.constant 0 : index
    %312 = vector.load %arg8[%c13_199, %c0_200] : memref<20x8xf32, #tpu.memory_space<vmem>>, vector<1x8xf32>
    %313 = arith.mulf %306, %12 : vector<8x8xf32>
    %cst_201 = arith.constant dense<0.000000e+00> : vector<8xf32>
    %314 = vector.multi_reduction <add>, %313, %cst_201 [0] : vector<8x8xf32> to vector<8xf32>
    %315 = vector.shape_cast %314 : vector<8xf32> to vector<1x8xf32>
    %316 = arith.addf %312, %315 : vector<1x8xf32>
    %c13_202 = arith.constant 13 : index
    %c0_203 = arith.constant 0 : index
    %317 = vector.load %arg8[%c13_202, %c0_203] : memref<20x8xf32, #tpu.memory_space<vmem>>, vector<1x8xf32>
    tpu.vector_store %arg8[%c13_202, %c0_203], %316 {strides = array<i32>} : memref<20x8xf32, #tpu.memory_space<vmem>>, vector<1x8xf32>,
    %cst_204 = arith.constant -9.500000e+00 : f32
    %318 = vector.broadcast %cst_204 : f32 to vector<8x8xf32>
    %319 = arith.mulf %5, %318 : vector<8x8xf32>
    %cst_205 = arith.constant -3.500000e+00 : f32
    %320 = vector.broadcast %cst_205 : f32 to vector<8x8xf32>
    %321 = arith.addf %319, %320 : vector<8x8xf32>
    %cst_206 = arith.constant 9.500000e+00 : f32
    %322 = vector.broadcast %cst_206 : f32 to vector<8x8xf32>
    %323 = arith.mulf %5, %322 : vector<8x8xf32>
    %cst_207 = arith.constant 5.500000e+00 : f32
    %324 = vector.broadcast %cst_207 : f32 to vector<8x8xf32>
    %325 = arith.addf %323, %324 : vector<8x8xf32>
    %326 = arith.minimumf %321, %325 : vector<8x8xf32>
    %cst_208 = arith.constant 0.000000e+00 : f32
    %327 = vector.broadcast %cst_208 : f32 to vector<8x8xf32>
    %328 = arith.maximumf %326, %327 : vector<8x8xf32>
    %c14 = arith.constant 14 : index
    %c0_209 = arith.constant 0 : index
    %329 = vector.load %arg7[%c14, %c0_209] : memref<20x8xf32, #tpu.memory_space<vmem>>, vector<1x8xf32>
    %cst_210 = arith.constant dense<0.000000e+00> : vector<8xf32>
    %330 = vector.multi_reduction <add>, %328, %cst_210 [0] : vector<8x8xf32> to vector<8xf32>
    %331 = vector.shape_cast %330 : vector<8xf32> to vector<1x8xf32>
    %332 = arith.addf %329, %331 : vector<1x8xf32>
    %c14_211 = arith.constant 14 : index
    %c0_212 = arith.constant 0 : index
    %333 = vector.load %arg7[%c14_211, %c0_212] : memref<20x8xf32, #tpu.memory_space<vmem>>, vector<1x8xf32>
    tpu.vector_store %arg7[%c14_211, %c0_212], %332 {strides = array<i32>} : memref<20x8xf32, #tpu.memory_space<vmem>>, vector<1x8xf32>,
    %c14_213 = arith.constant 14 : index
    %c0_214 = arith.constant 0 : index
    %334 = vector.load %arg8[%c14_213, %c0_214] : memref<20x8xf32, #tpu.memory_space<vmem>>, vector<1x8xf32>
    %335 = arith.mulf %328, %12 : vector<8x8xf32>
    %cst_215 = arith.constant dense<0.000000e+00> : vector<8xf32>
    %336 = vector.multi_reduction <add>, %335, %cst_215 [0] : vector<8x8xf32> to vector<8xf32>
    %337 = vector.shape_cast %336 : vector<8xf32> to vector<1x8xf32>
    %338 = arith.addf %334, %337 : vector<1x8xf32>
    %c14_216 = arith.constant 14 : index
    %c0_217 = arith.constant 0 : index
    %339 = vector.load %arg8[%c14_216, %c0_217] : memref<20x8xf32, #tpu.memory_space<vmem>>, vector<1x8xf32>
    tpu.vector_store %arg8[%c14_216, %c0_217], %338 {strides = array<i32>} : memref<20x8xf32, #tpu.memory_space<vmem>>, vector<1x8xf32>,
    %cst_218 = arith.constant -9.500000e+00 : f32
    %340 = vector.broadcast %cst_218 : f32 to vector<8x8xf32>
    %341 = arith.mulf %5, %340 : vector<8x8xf32>
    %cst_219 = arith.constant -4.500000e+00 : f32
    %342 = vector.broadcast %cst_219 : f32 to vector<8x8xf32>
    %343 = arith.addf %341, %342 : vector<8x8xf32>
    %cst_220 = arith.constant 9.500000e+00 : f32
    %344 = vector.broadcast %cst_220 : f32 to vector<8x8xf32>
    %345 = arith.mulf %5, %344 : vector<8x8xf32>
    %cst_221 = arith.constant 6.500000e+00 : f32
    %346 = vector.broadcast %cst_221 : f32 to vector<8x8xf32>
    %347 = arith.addf %345, %346 : vector<8x8xf32>
    %348 = arith.minimumf %343, %347 : vector<8x8xf32>
    %cst_222 = arith.constant 0.000000e+00 : f32
    %349 = vector.broadcast %cst_222 : f32 to vector<8x8xf32>
    %350 = arith.maximumf %348, %349 : vector<8x8xf32>
    %c15 = arith.constant 15 : index
    %c0_223 = arith.constant 0 : index
    %351 = vector.load %arg7[%c15, %c0_223] : memref<20x8xf32, #tpu.memory_space<vmem>>, vector<1x8xf32>
    %cst_224 = arith.constant dense<0.000000e+00> : vector<8xf32>
    %352 = vector.multi_reduction <add>, %350, %cst_224 [0] : vector<8x8xf32> to vector<8xf32>
    %353 = vector.shape_cast %352 : vector<8xf32> to vector<1x8xf32>
    %354 = arith.addf %351, %353 : vector<1x8xf32>
    %c15_225 = arith.constant 15 : index
    %c0_226 = arith.constant 0 : index
    %355 = vector.load %arg7[%c15_225, %c0_226] : memref<20x8xf32, #tpu.memory_space<vmem>>, vector<1x8xf32>
    tpu.vector_store %arg7[%c15_225, %c0_226], %354 {strides = array<i32>} : memref<20x8xf32, #tpu.memory_space<vmem>>, vector<1x8xf32>,
    %c15_227 = arith.constant 15 : index
    %c0_228 = arith.constant 0 : index
    %356 = vector.load %arg8[%c15_227, %c0_228] : memref<20x8xf32, #tpu.memory_space<vmem>>, vector<1x8xf32>
    %357 = arith.mulf %350, %12 : vector<8x8xf32>
    %cst_229 = arith.constant dense<0.000000e+00> : vector<8xf32>
    %358 = vector.multi_reduction <add>, %357, %cst_229 [0] : vector<8x8xf32> to vector<8xf32>
    %359 = vector.shape_cast %358 : vector<8xf32> to vector<1x8xf32>
    %360 = arith.addf %356, %359 : vector<1x8xf32>
    %c15_230 = arith.constant 15 : index
    %c0_231 = arith.constant 0 : index
    %361 = vector.load %arg8[%c15_230, %c0_231] : memref<20x8xf32, #tpu.memory_space<vmem>>, vector<1x8xf32>
    tpu.vector_store %arg8[%c15_230, %c0_231], %360 {strides = array<i32>} : memref<20x8xf32, #tpu.memory_space<vmem>>, vector<1x8xf32>,
    %cst_232 = arith.constant -9.500000e+00 : f32
    %362 = vector.broadcast %cst_232 : f32 to vector<8x8xf32>
    %363 = arith.mulf %5, %362 : vector<8x8xf32>
    %cst_233 = arith.constant -5.500000e+00 : f32
    %364 = vector.broadcast %cst_233 : f32 to vector<8x8xf32>
    %365 = arith.addf %363, %364 : vector<8x8xf32>
    %cst_234 = arith.constant 9.500000e+00 : f32
    %366 = vector.broadcast %cst_234 : f32 to vector<8x8xf32>
    %367 = arith.mulf %5, %366 : vector<8x8xf32>
    %cst_235 = arith.constant 7.500000e+00 : f32
    %368 = vector.broadcast %cst_235 : f32 to vector<8x8xf32>
    %369 = arith.addf %367, %368 : vector<8x8xf32>
    %370 = arith.minimumf %365, %369 : vector<8x8xf32>
    %cst_236 = arith.constant 0.000000e+00 : f32
    %371 = vector.broadcast %cst_236 : f32 to vector<8x8xf32>
    %372 = arith.maximumf %370, %371 : vector<8x8xf32>
    %c16 = arith.constant 16 : index
    %c0_237 = arith.constant 0 : index
    %373 = vector.load %arg7[%c16, %c0_237] : memref<20x8xf32, #tpu.memory_space<vmem>>, vector<1x8xf32>
    %cst_238 = arith.constant dense<0.000000e+00> : vector<8xf32>
    %374 = vector.multi_reduction <add>, %372, %cst_238 [0] : vector<8x8xf32> to vector<8xf32>
    %375 = vector.shape_cast %374 : vector<8xf32> to vector<1x8xf32>
    %376 = arith.addf %373, %375 : vector<1x8xf32>
    %c16_239 = arith.constant 16 : index
    %c0_240 = arith.constant 0 : index
    %377 = vector.load %arg7[%c16_239, %c0_240] : memref<20x8xf32, #tpu.memory_space<vmem>>, vector<1x8xf32>
    tpu.vector_store %arg7[%c16_239, %c0_240], %376 {strides = array<i32>} : memref<20x8xf32, #tpu.memory_space<vmem>>, vector<1x8xf32>,
    %c16_241 = arith.constant 16 : index
    %c0_242 = arith.constant 0 : index
    %378 = vector.load %arg8[%c16_241, %c0_242] : memref<20x8xf32, #tpu.memory_space<vmem>>, vector<1x8xf32>
    %379 = arith.mulf %372, %12 : vector<8x8xf32>
    %cst_243 = arith.constant dense<0.000000e+00> : vector<8xf32>
    %380 = vector.multi_reduction <add>, %379, %cst_243 [0] : vector<8x8xf32> to vector<8xf32>
    %381 = vector.shape_cast %380 : vector<8xf32> to vector<1x8xf32>
    %382 = arith.addf %378, %381 : vector<1x8xf32>
    %c16_244 = arith.constant 16 : index
    %c0_245 = arith.constant 0 : index
    %383 = vector.load %arg8[%c16_244, %c0_245] : memref<20x8xf32, #tpu.memory_space<vmem>>, vector<1x8xf32>
    tpu.vector_store %arg8[%c16_244, %c0_245], %382 {strides = array<i32>} : memref<20x8xf32, #tpu.memory_space<vmem>>, vector<1x8xf32>,
    %cst_246 = arith.constant -9.500000e+00 : f32
    %384 = vector.broadcast %cst_246 : f32 to vector<8x8xf32>
    %385 = arith.mulf %5, %384 : vector<8x8xf32>
    %cst_247 = arith.constant -6.500000e+00 : f32
    %386 = vector.broadcast %cst_247 : f32 to vector<8x8xf32>
    %387 = arith.addf %385, %386 : vector<8x8xf32>
    %cst_248 = arith.constant 9.500000e+00 : f32
    %388 = vector.broadcast %cst_248 : f32 to vector<8x8xf32>
    %389 = arith.mulf %5, %388 : vector<8x8xf32>
    %cst_249 = arith.constant 8.500000e+00 : f32
    %390 = vector.broadcast %cst_249 : f32 to vector<8x8xf32>
    %391 = arith.addf %389, %390 : vector<8x8xf32>
    %392 = arith.minimumf %387, %391 : vector<8x8xf32>
    %cst_250 = arith.constant 0.000000e+00 : f32
    %393 = vector.broadcast %cst_250 : f32 to vector<8x8xf32>
    %394 = arith.maximumf %392, %393 : vector<8x8xf32>
    %c17 = arith.constant 17 : index
    %c0_251 = arith.constant 0 : index
    %395 = vector.load %arg7[%c17, %c0_251] : memref<20x8xf32, #tpu.memory_space<vmem>>, vector<1x8xf32>
    %cst_252 = arith.constant dense<0.000000e+00> : vector<8xf32>
    %396 = vector.multi_reduction <add>, %394, %cst_252 [0] : vector<8x8xf32> to vector<8xf32>
    %397 = vector.shape_cast %396 : vector<8xf32> to vector<1x8xf32>
    %398 = arith.addf %395, %397 : vector<1x8xf32>
    %c17_253 = arith.constant 17 : index
    %c0_254 = arith.constant 0 : index
    %399 = vector.load %arg7[%c17_253, %c0_254] : memref<20x8xf32, #tpu.memory_space<vmem>>, vector<1x8xf32>
    tpu.vector_store %arg7[%c17_253, %c0_254], %398 {strides = array<i32>} : memref<20x8xf32, #tpu.memory_space<vmem>>, vector<1x8xf32>,
    %c17_255 = arith.constant 17 : index
    %c0_256 = arith.constant 0 : index
    %400 = vector.load %arg8[%c17_255, %c0_256] : memref<20x8xf32, #tpu.memory_space<vmem>>, vector<1x8xf32>
    %401 = arith.mulf %394, %12 : vector<8x8xf32>
    %cst_257 = arith.constant dense<0.000000e+00> : vector<8xf32>
    %402 = vector.multi_reduction <add>, %401, %cst_257 [0] : vector<8x8xf32> to vector<8xf32>
    %403 = vector.shape_cast %402 : vector<8xf32> to vector<1x8xf32>
    %404 = arith.addf %400, %403 : vector<1x8xf32>
    %c17_258 = arith.constant 17 : index
    %c0_259 = arith.constant 0 : index
    %405 = vector.load %arg8[%c17_258, %c0_259] : memref<20x8xf32, #tpu.memory_space<vmem>>, vector<1x8xf32>
    tpu.vector_store %arg8[%c17_258, %c0_259], %404 {strides = array<i32>} : memref<20x8xf32, #tpu.memory_space<vmem>>, vector<1x8xf32>,
    %cst_260 = arith.constant -9.500000e+00 : f32
    %406 = vector.broadcast %cst_260 : f32 to vector<8x8xf32>
    %407 = arith.mulf %5, %406 : vector<8x8xf32>
    %cst_261 = arith.constant -7.500000e+00 : f32
    %408 = vector.broadcast %cst_261 : f32 to vector<8x8xf32>
    %409 = arith.addf %407, %408 : vector<8x8xf32>
    %cst_262 = arith.constant 9.500000e+00 : f32
    %410 = vector.broadcast %cst_262 : f32 to vector<8x8xf32>
    %411 = arith.mulf %5, %410 : vector<8x8xf32>
    %cst_263 = arith.constant 9.500000e+00 : f32
    %412 = vector.broadcast %cst_263 : f32 to vector<8x8xf32>
    %413 = arith.addf %411, %412 : vector<8x8xf32>
    %414 = arith.minimumf %409, %413 : vector<8x8xf32>
    %cst_264 = arith.constant 0.000000e+00 : f32
    %415 = vector.broadcast %cst_264 : f32 to vector<8x8xf32>
    %416 = arith.maximumf %414, %415 : vector<8x8xf32>
    %c18 = arith.constant 18 : index
    %c0_265 = arith.constant 0 : index
    %417 = vector.load %arg7[%c18, %c0_265] : memref<20x8xf32, #tpu.memory_space<vmem>>, vector<1x8xf32>
    %cst_266 = arith.constant dense<0.000000e+00> : vector<8xf32>
    %418 = vector.multi_reduction <add>, %416, %cst_266 [0] : vector<8x8xf32> to vector<8xf32>
    %419 = vector.shape_cast %418 : vector<8xf32> to vector<1x8xf32>
    %420 = arith.addf %417, %419 : vector<1x8xf32>
    %c18_267 = arith.constant 18 : index
    %c0_268 = arith.constant 0 : index
    %421 = vector.load %arg7[%c18_267, %c0_268] : memref<20x8xf32, #tpu.memory_space<vmem>>, vector<1x8xf32>
    tpu.vector_store %arg7[%c18_267, %c0_268], %420 {strides = array<i32>} : memref<20x8xf32, #tpu.memory_space<vmem>>, vector<1x8xf32>,
    %c18_269 = arith.constant 18 : index
    %c0_270 = arith.constant 0 : index
    %422 = vector.load %arg8[%c18_269, %c0_270] : memref<20x8xf32, #tpu.memory_space<vmem>>, vector<1x8xf32>
    %423 = arith.mulf %416, %12 : vector<8x8xf32>
    %cst_271 = arith.constant dense<0.000000e+00> : vector<8xf32>
    %424 = vector.multi_reduction <add>, %423, %cst_271 [0] : vector<8x8xf32> to vector<8xf32>
    %425 = vector.shape_cast %424 : vector<8xf32> to vector<1x8xf32>
    %426 = arith.addf %422, %425 : vector<1x8xf32>
    %c18_272 = arith.constant 18 : index
    %c0_273 = arith.constant 0 : index
    %427 = vector.load %arg8[%c18_272, %c0_273] : memref<20x8xf32, #tpu.memory_space<vmem>>, vector<1x8xf32>
    tpu.vector_store %arg8[%c18_272, %c0_273], %426 {strides = array<i32>} : memref<20x8xf32, #tpu.memory_space<vmem>>, vector<1x8xf32>,
    %cst_274 = arith.constant -9.500000e+00 : f32
    %428 = vector.broadcast %cst_274 : f32 to vector<8x8xf32>
    %429 = arith.mulf %5, %428 : vector<8x8xf32>
    %cst_275 = arith.constant -8.500000e+00 : f32
    %430 = vector.broadcast %cst_275 : f32 to vector<8x8xf32>
    %431 = arith.addf %429, %430 : vector<8x8xf32>
    %cst_276 = arith.constant 0.000000e+00 : f32
    %cst_277 = arith.constant 1.000000e+00 : f32
    %432 = vector.broadcast %cst_276 : f32 to vector<8x8xf32>
    %433 = arith.maximumf %432, %431 : vector<8x8xf32>
    %434 = vector.broadcast %cst_277 : f32 to vector<8x8xf32>
    %435 = arith.minimumf %434, %433 : vector<8x8xf32>
    %c19 = arith.constant 19 : index
    %c0_278 = arith.constant 0 : index
    %436 = vector.load %arg7[%c19, %c0_278] : memref<20x8xf32, #tpu.memory_space<vmem>>, vector<1x8xf32>
    %cst_279 = arith.constant dense<0.000000e+00> : vector<8xf32>
    %437 = vector.multi_reduction <add>, %435, %cst_279 [0] : vector<8x8xf32> to vector<8xf32>
    %438 = vector.shape_cast %437 : vector<8xf32> to vector<1x8xf32>
    %439 = arith.addf %436, %438 : vector<1x8xf32>
    %c19_280 = arith.constant 19 : index
    %c0_281 = arith.constant 0 : index
    %440 = vector.load %arg7[%c19_280, %c0_281] : memref<20x8xf32, #tpu.memory_space<vmem>>, vector<1x8xf32>
    tpu.vector_store %arg7[%c19_280, %c0_281], %439 {strides = array<i32>} : memref<20x8xf32, #tpu.memory_space<vmem>>, vector<1x8xf32>,
    %c19_282 = arith.constant 19 : index
    %c0_283 = arith.constant 0 : index
    %441 = vector.load %arg8[%c19_282, %c0_283] : memref<20x8xf32, #tpu.memory_space<vmem>>, vector<1x8xf32>
    %442 = arith.mulf %435, %12 : vector<8x8xf32>
    %cst_284 = arith.constant dense<0.000000e+00> : vector<8xf32>
    %443 = vector.multi_reduction <add>, %442, %cst_284 [0] : vector<8x8xf32> to vector<8xf32>
    %444 = vector.shape_cast %443 : vector<8xf32> to vector<1x8xf32>
    %445 = arith.addf %441, %444 : vector<1x8xf32>
    %c19_285 = arith.constant 19 : index
    %c0_286 = arith.constant 0 : index
    %446 = vector.load %arg8[%c19_285, %c0_286] : memref<20x8xf32, #tpu.memory_space<vmem>>, vector<1x8xf32>
    tpu.vector_store %arg8[%c19_285, %c0_286], %445 {strides = array<i32>} : memref<20x8xf32, #tpu.memory_space<vmem>>, vector<1x8xf32>,
    %c0_i32_287 = arith.constant 0 : i32
    %447 = arith.cmpi eq, %arg1, %c0_i32_287 : i32
    %448 = arith.extui %447 : i1 to i32
    %c0_i32_288 = arith.constant 0 : i32
    %449 = arith.cmpi ne, %448, %c0_i32_288 : i32
    scf.if %449 {
      %c0_289 = arith.constant 0 : index
      %c0_290 = arith.constant 0 : index
      %450 = vector.load %arg7[%c0_289, %c0_290] : memref<20x8xf32, #tpu.memory_space<vmem>>, vector<20x8xf32>
      %c0_291 = arith.constant 0 : index
      %c0_292 = arith.constant 0 : index
      %451 = vector.load %arg8[%c0_291, %c0_292] : memref<20x8xf32, #tpu.memory_space<vmem>>, vector<20x8xf32>
      %452 = tpu.iota {dimensions = array<i32: 0>} : vector<20x20xi32>
      %453 = tpu.iota {dimensions = array<i32: 1>} : vector<20x20xi32>
      %454 = arith.cmpi sle, %453, %452 : vector<20x20xi32>
      %455 = arith.extui %454 : vector<20x20xi1> to vector<20x20xi32>
      %456 = arith.sitofp %455 : vector<20x20xi32> to vector<20x20xf32>
      %cst_293 = arith.constant dense<0.000000e+00> : vector<20x8xf32>
      %457 = tpu.matmul %456, %451, %cst_293 {dimension_numbers = #tpu.dot_dimension_numbers<[1], [0], [0], [1], [0, 0, 1, 1], [], []>} : vector<20x20xf32>, vector<20x8xf32>, vector<20x8xf32> -> vector<20x8xf32>
      %cst_294 = arith.constant dense<0.000000e+00> : vector<20x8xf32>
      %458 = tpu.matmul %456, %450, %cst_294 {dimension_numbers = #tpu.dot_dimension_numbers<[1], [0], [0], [1], [0, 0, 1, 1], [], []>} : vector<20x20xf32>, vector<20x8xf32>, vector<20x8xf32> -> vector<20x8xf32>
      %cst_295 = arith.constant 1.000000e-16 : f32
      %459 = vector.broadcast %cst_295 : f32 to vector<20x8xf32>
      %460 = arith.addf %459, %458 : vector<20x8xf32>
      %461 = arith.divf %457, %460 : vector<20x8xf32>
      %cst_296 = arith.constant dense<0.000000e+00> : vector<8xf32>
      %462 = vector.multi_reduction <add>, %451, %cst_296 [0] : vector<20x8xf32> to vector<8xf32>
      %463 = vector.shape_cast %462 : vector<8xf32> to vector<1x8xf32>
      %464 = vector.broadcast %463 : vector<1x8xf32> to vector<20x8xf32>
      %465 = arith.divf %451, %464 : vector<20x8xf32>
      %466 = arith.mulf %461, %465 : vector<20x8xf32>
      %cst_297 = arith.constant dense<0.000000e+00> : vector<8xf32>
      %467 = vector.multi_reduction <add>, %466, %cst_297 [0] : vector<20x8xf32> to vector<8xf32>
      %468 = vector.shape_cast %467 : vector<8xf32> to vector<1x8xf32>
      %469 = vector.shape_cast %468 : vector<1x8xf32> to vector<1x1x8xf32>
      %c0_298 = arith.constant 0 : index
      %c0_299 = arith.constant 0 : index
      %c0_300 = arith.constant 0 : index
      %470 = vector.load %arg6[%c0_298, %c0_299, %c0_300] : memref<1x1x8xf32, #tpu.memory_space<vmem>>, vector<1x1x8xf32>
      tpu.vector_store %arg6[%c0_298, %c0_299, %c0_300], %469 {strides = array<i32>} : memref<1x1x8xf32, #tpu.memory_space<vmem>>, vector<1x1x8xf32>,
    } else {
    }
    return
  }
  func.func @transform_0(%arg0: i32, %arg1: i32) -> (i32, i32) {
    %c0_i32 = arith.constant 0 : i32
    %c0_i32_0 = arith.constant 0 : i32
    return %arg1, %c0_i32 : i32, i32
  }
  func.func @transform_1(%arg0: i32, %arg1: i32) -> (i32, i32) {
    %c0_i32 = arith.constant 0 : i32
    %c0_i32_0 = arith.constant 0 : i32
    return %c0_i32, %arg0 : i32, i32
  }
  func.func @transform_2(%arg0: i32, %arg1: i32) -> (i32, i32) {
    %c0_i32 = arith.constant 0 : i32
    %c0_i32_0 = arith.constant 0 : i32
    return %arg1, %c0_i32 : i32, i32
  }
  func.func @transform_3(%arg0: i32, %arg1: i32) -> (i32, i32) {
    %c0_i32 = arith.constant 0 : i32
    %c0_i32_0 = arith.constant 0 : i32
    return %c0_i32, %arg0 : i32, i32
  }
  func.func @transform_4(%arg0: i32, %arg1: i32) -> (i32, i32, i32) {
    %c0_i32 = arith.constant 0 : i32
    %c0_i32_0 = arith.constant 0 : i32
    %c0_i32_1 = arith.constant 0 : i32
    return %arg0, %c0_i32, %c0_i32_0 : i32, i32, i32
  }
}

</mosaic_0001>

<bundles_post_ra>
// kernel: tpu_custom_call.1
= control target key start
LH: loop header
LB: loop body
LE: loop exit
PB: predicated region body
PF: predicated region fallthrough
CT: control target
= control target key end

     0   :  { %v988_v1 = vmov 0.0   ;;  %vm989_vm0 = vmmov 0   ;;  %v990_v4 = vmov 0   ;;  %s1368_s0 = inlined_call_operand.vmem [shape: f32[8,32], index: 0, kind: input, shape index: {}]   ;;  %s1369_s1 = inlined_call_operand.vmem [shape: f32[32,8], index: 1, kind: input, shape index: {}]   ;;  %s1370_s2 = inlined_call_operand.vmem [shape: s32[8,1], index: 2, kind: input, shape index: {}]   ;;  %s1371_s3 = inlined_call_operand.vmem [shape: s32[1,8], index: 3, kind: input, shape index: {}]   ;;  %s1372_s4 = inlined_call_operand.hbm [shape: f32[1,1,8], index: 4, kind: output, shape index: {}]  }
   0x1   :  { %v34_v0 = vld [vmem:[%s1369_s1 + $0x18] sm:$0xff]  ;;  %906 = vmatprep.subr.mxu0 %v988_v1  ;;  %v33_v2 = vld [vmem:[%s1369_s1 + $0x10] sm:$0xff]  ;;  %914 = vmatprep.mubr.msk.f32.mxu0 %vm989_vm0, %v988_v1  ;;  %v109_v3 = vld [vmem:[%s1370_s2] sm:$0xff] }
   0x2   :  { %907 = vmatpush3.msra.mxu0 %v34_v0  ;;  %957 = vset.pattern.permute.xlu0 %v990_v4 }
   0x3   :  { %9 = vsyncpa [#allocation5], 0  ;;  %908 = vmatprep.subr.mxu0 %v988_v1  ;;  %v32_v5 = vld [vmem:[%s1369_s1 + $0x8] sm:$0xff]  ;;  %112 = vperm.xlu0 %957, %v109_v3   ;;  %v31_v6 = vld [vmem:[%s1369_s1] sm:$0xff]  ;;  %vm35_vm1 = vcmask 261120   ;;  %vm22_vm2 = vcmask 64512   ;;  %v632_v15 = vlaneseq }
   0x4   :  { %909 = vmatpush3.msra.mxu0 %v33_v2  ;;  %917 = vmatprep.subr.mxu1 %v988_v1  ;;  %v30_v7 = vld [vmem:[%s1368_s0] sm:$0xff]  ;;  %vm25_vm3 = vcmask 60416   ;;  %23 = vst.msk [vmem:[#allocation2] sm:$0xff] %vm22_vm2, %v988_v1  ;;  %24 = vst.msk [vmem:[#allocation2 + $0x8] sm:$0xff] %vm22_vm2, %v988_v1  ;;  %vm135_vm5 = vcmask 57344   ;;  %vm657_vm6 = vcmask 1043456  }
   0x5   :  { %910 = vmatprep.subr.mxu0 %v988_v1  ;;  %923 = vmatprep.mubr.msk.f32.mxu1 %vm989_vm0, %v988_v1  ;;  %26 = vst.msk [vmem:[#allocation2 + $0x10] sm:$0xf] %vm25_vm3, %v988_v1  ;;  %29 = vst.msk [vmem:[#allocation3 + $0x10] sm:$0xf] %vm25_vm3, %v988_v1  ;;  %v876_v8 = vld [vmem:[%s1371_s3] ss:$0 sm:$0xff] }
   0x6   :  { %911 = vmatpush3.msra.mxu0 %v32_v5  ;;  %27 = vst.msk [vmem:[#allocation3] sm:$0xff] %vm22_vm2, %v988_v1  ;;  %28 = vst.msk [vmem:[#allocation3 + $0x8] sm:$0xff] %vm22_vm2, %v988_v1  ;;  %vm647_vm8 = vcmask 162816   ;;  %s991_s3 = smov [#allocation4]  }
   0x7   :  { %912 = vmatprep.subr.mxu0 %v988_v1  ;;  %s867_s26 = sshll.u32 %s991_s3, 4  ;;  %s868_s26 = int_to_ptr.vmem [resolvable:$true] %s867_s26 }
   0x8   :  { %913 = vmatpush3.msra.mxu0 %v31_v6  ;;  %s966_s27 = scalar_lea.vmem %s868_s26, 16  ;;  %s970_s28 = scalar_lea.vmem %s868_s26, 32 }
   0x9   :  { %915 = vmatmul.mubr.msk.f32.vlgmr.msra.gmra.mxu0 %vm35_vm1, %v30_v7  ;;  %932 = vmatprep.subr.mxu0 %v988_v1  ;;  %p967_p0 = scmp.ne.s32.totalorder %s868_s26, %s966_s27  ;;  %p971_p1 = scmp.lt.s32.totalorder %s868_s26, %s868_s26 }
   0xa   :  { %938 = vmatprep.mubr.msk.f32.mxu0 %vm989_vm0, %v988_v1  ;;  %p972_p2 = scmp.lt.s32.totalorder %s970_s28, %s966_s27 }
   0xc   :  { %p973_p3 = por %p972_p2, %p971_p1 }
   0xe   :  { %p974_p4 = pnand %p973_p3, %p967_p0 }
  0x7e   :  { %v113_v9 = vpop.permute.xlu0 %112 }
  0x7f   :  { %vm118_vm4 = vcmp.eq.s32.totalorder %v113_v9, %v876_v8 }
  0x80   :  { %v1067_v14 = vsel %vm118_vm4, 1.0, %v988_v1 }
  0xc9   :  { %v105_v10 = vpop.f32.mrf.mxu0 }
  0xca   :  { %v1062_v11 = vmul.f32 9.5, %v105_v10  ;;  %v1064_v12 = vmul.f32 -9.5, %v105_v10 }
  0xcb   :  { %v916_v13 = vpop.f32.mrf.mxu0 }
  0xcc   :  { %v524_v16 = vadd.f32 -5.5, %v1064_v12  ;;  %v525_v17 = vadd.f32 7.5, %v1062_v11  ;;  %v549_v18 = vadd.f32 -6.5, %v1064_v12  ;;  %v550_v19 = vadd.f32 8.5, %v1062_v11 }
  0xcd   :  { %v574_v20 = vadd.f32 -7.5, %v1064_v12  ;;  %v575_v21 = vadd.f32 9.5, %v1062_v11  ;;  %v599_v22 = vadd.f32 -8.5, %v1064_v12  ;;  %v1077_v23 = vadd.f32 2.5, %v1064_v12 }
  0xce   :  { %v526_v24 = vmin.f32 %v524_v16, %v525_v17  ;;  %v551_v25 = vmin.f32 %v549_v18, %v550_v19  ;;  %v1080_v26 = vadd.f32 -0.5, %v1062_v11  ;;  %v1083_v27 = vadd.f32 1.5, %v1064_v12 }
  0xcf   :  { %v576_v28 = vmin.f32 %v574_v20, %v575_v21  ;;  %v600_v29 = vmax.f32 %v599_v22, 0.0  ;;  %v1086_v30 = vadd.f32 0.5, %v1062_v11  ;;  %v1089_v31 = vadd.f32 0.5, %v1064_v12  ;;  %v528_v21 = vld [vmem:[#allocation2 + $0x10] sm:$0x1] }
  0xd0   :  { %v527_v32 = vmax.f32 %v526_v24, 0.0  ;;  %v552_v33 = vmax.f32 %v551_v25, 0.0  ;;  %v326_v34 = vmin.f32 %v1077_v23, %v1080_v26  ;;  %v1094_v35 = vadd.f32 1.5, %v1062_v11  ;;  %v553_v22 = vld [vmem:[#allocation2 + $0x11] sm:$0x1] }
  0xd1   :  { %v577_v36 = vmax.f32 %v576_v28, 0.0  ;;  %v601_v37 = vmin.f32 %v600_v29, 1.0  ;;  %v351_v38 = vmin.f32 %v1083_v27, %v1086_v30  ;;  %v1099_v39 = vadd.f32 -0.5, %v1064_v12  ;;  %v612_v23 = vld [vmem:[#allocation3 + $0x13] sm:$0x1] }
  0xd2   :  { %v529_v40 = vsel %vm22_vm2, %v527_v32, 0.0  ;;  %v554_v41 = vsel %vm22_vm2, %v552_v33, 0.0  ;;  %v539_v42 = vmul.f32 %v1067_v14, %v527_v32  ;;  %v564_v43 = vmul.f32 %v1067_v14, %v552_v33 }
  0xd3   :  { %v530_v44 = vrot.slane %v529_v40, 4  ;;  %v555_v45 = vrot.slane %v554_v41, 4  ;;  %v579_v46 = vsel %vm22_vm2, %v577_v36, 0.0  ;;  %v603_v47 = vsel %vm22_vm2, %v601_v37, 0.0 }
  0xd4   :  { %v580_v48 = vrot.slane %v579_v46, 4  ;;  %v604_v49 = vrot.slane %v603_v47, 4  ;;  %v540_v50 = vsel %vm22_vm2, %v539_v42, 0.0  ;;  %v565_v51 = vsel %vm22_vm2, %v564_v43, 0.0 }
  0xd5   :  { %v531_v52 = vadd.f32 %v530_v44, %v529_v40  ;;  %v556_v53 = vadd.f32 %v555_v45, %v554_v41  ;;  %v541_v54 = vrot.slane %v540_v50, 4  ;;  %v566_v55 = vrot.slane %v565_v51, 4  ;;  %v538_v44 = vld [vmem:[#allocation3 + $0x10] sm:$0x1]  ;;  %v563_v45 = vld [vmem:[#allocation3 + $0x11] sm:$0x1] }
  0xd6   :  { %v581_v56 = vadd.f32 %v580_v48, %v579_v46  ;;  %v605_v57 = vadd.f32 %v604_v49, %v603_v47  ;;  %v589_v58 = vmul.f32 %v1067_v14, %v577_v36  ;;  %v613_v59 = vmul.f32 %v1067_v14, %v601_v37  ;;  %v578_v36 = vld [vmem:[#allocation2 + $0x12] sm:$0x1]  ;;  %v602_v37 = vld [vmem:[#allocation2 + $0x13] sm:$0x1] }
  0xd7   :  { %v532_v60 = vrot.slane %v531_v52, 2  ;;  %v557_v61 = vrot.slane %v556_v53, 2  ;;  %v542_v62 = vadd.f32 %v541_v54, %v540_v50  ;;  %v567_v63 = vadd.f32 %v566_v55, %v565_v51 }
  0xd8   :  { %v582_v0 = vrot.slane %v581_v56, 2  ;;  %v606_v2 = vrot.slane %v605_v57, 2  ;;  %v590_v3 = vsel %vm22_vm2, %v589_v58, 0.0  ;;  %v614_v4 = vsel %vm22_vm2, %v613_v59, 0.0 }
  0xd9   :  { %v533_v5 = vadd.f32 %v532_v60, %v531_v52  ;;  %v558_v6 = vadd.f32 %v557_v61, %v556_v53  ;;  %v543_v7 = vrot.slane %v542_v62, 2  ;;  %v568_v8 = vrot.slane %v567_v63, 2  ;;  %v588_v60 = vld [vmem:[#allocation3 + $0x12] sm:$0x1] }
  0xda   :  { %v583_v9 = vadd.f32 %v582_v0, %v581_v56  ;;  %v607_v10 = vadd.f32 %v606_v2, %v605_v57  ;;  %v591_v13 = vrot.slane %v590_v3, 4  ;;  %v615_v16 = vrot.slane %v614_v4, 4 }
  0xdb   :  { %v534_v17 = vrot.slane %v533_v5, 1  ;;  %v559_v18 = vrot.slane %v558_v6, 1  ;;  %v544_v19 = vadd.f32 %v543_v7, %v542_v62  ;;  %v569_v20 = vadd.f32 %v568_v8, %v567_v63 }
  0xdc   :  { %v584_v24 = vrot.slane %v583_v9, 1  ;;  %v608_v25 = vrot.slane %v607_v10, 1  ;;  %v592_v28 = vadd.f32 %v591_v13, %v590_v3  ;;  %v616_v29 = vadd.f32 %v615_v16, %v614_v4 }
  0xdd   :  { %v535_v32 = vadd.f32 %v534_v17, %v533_v5  ;;  %v560_v33 = vadd.f32 %v559_v18, %v558_v6  ;;  %v545_v40 = vrot.slane %v544_v19, 1  ;;  %v570_v41 = vrot.slane %v569_v20, 1 }
  0xde   :  { %v585_v42 = vadd.f32 %v584_v24, %v583_v9  ;;  %v609_v43 = vadd.f32 %v608_v25, %v607_v10  ;;  %v593_v46 = vrot.slane %v592_v28, 2  ;;  %v617_v47 = vrot.slane %v616_v29, 2 }
  0xdf   :  { %v536_v48 = vadd.f32 %v535_v32, %v528_v21  ;;  %v561_v49 = vadd.f32 %v560_v33, %v553_v22  ;;  %v546_v50 = vadd.f32 %v545_v40, %v544_v19  ;;  %v571_v51 = vadd.f32 %v570_v41, %v569_v20 }
  0xe0   :  { %v586_v52 = vadd.f32 %v585_v42, %v578_v36  ;;  %v610_v53 = vadd.f32 %v609_v43, %v602_v37  ;;  %v594_v54 = vadd.f32 %v593_v46, %v592_v28  ;;  %v618_v55 = vadd.f32 %v617_v47, %v616_v29 }
  0xe1   :  { %537 = vst.msk [vmem:[#allocation2 + $0x10] sm:$0x1] %vm135_vm5, %v536_v48  ;;  %562 = vst.msk [vmem:[#allocation2 + $0x11] sm:$0x1] %vm135_vm5, %v561_v49  ;;  %v547_v56 = vadd.f32 %v546_v50, %v538_v44  ;;  %v572_v57 = vadd.f32 %v571_v51, %v563_v45  ;;  %v1118_v58 = vmax.f32 %v326_v34, 0.0  ;;  %v1123_v59 = vmax.f32 %v351_v38, 0.0 }
  0xe2   :  { %587 = vst.msk [vmem:[#allocation2 + $0x12] sm:$0x1] %vm135_vm5, %v586_v52  ;;  %611 = vst.msk [vmem:[#allocation2 + $0x13] sm:$0x1] %vm135_vm5, %v610_v53  ;;  %v595_v61 = vrot.slane %v594_v54, 1  ;;  %v619_v62 = vrot.slane %v618_v55, 1  ;;  %v376_v63 = vmin.f32 %v1089_v31, %v1094_v35 }
  0xe3   :  { %v400_v0 = vadd.f32 2.5, %v1062_v11  ;;  %548 = vst.msk [vmem:[#allocation3 + $0x10] sm:$0x1] %vm135_vm5, %v547_v56  ;;  %573 = vst.msk [vmem:[#allocation3 + $0x11] sm:$0x1] %vm135_vm5, %v572_v57  ;;  %v329_v26 = vsel %vm22_vm2, %v1118_v58, 0.0 }
  0xe4   :  { %v354_v27 = vsel %vm22_vm2, %v1123_v59, 0.0  ;;  %v424_v30 = vadd.f32 -1.5, %v1064_v12  ;;  %v425_v34 = vadd.f32 3.5, %v1062_v11  ;;  %v596_v38 = vadd.f32 %v595_v61, %v594_v54  ;;  %v328_v44 = vld [vmem:[#allocation2 + $0x8] sm:$0x1] }
  0xe5   :  { %v620_v2 = vadd.f32 %v619_v62, %v618_v55  ;;  %v330_v31 = vrot.slane %v329_v26, 4  ;;  %v355_v35 = vrot.slane %v354_v27, 4  ;;  %v1138_v3 = vmax.f32 %v376_v63, 0.0  ;;  %v353_v49 = vld [vmem:[#allocation2 + $0x9] sm:$0x1] }
  0xe6   :  { %v401_v4 = vmin.f32 %v1099_v39, %v400_v0  ;;  %v426_v5 = vmin.f32 %v424_v30, %v425_v34  ;;  %v449_v6 = vadd.f32 -2.5, %v1064_v12  ;;  %v597_v7 = vadd.f32 %v596_v38, %v588_v60  ;;  %v378_v34 = vld [vmem:[#allocation2 + $0xa] sm:$0x1] }
  0xe7   :  { %v621_v8 = vadd.f32 %v620_v2, %v612_v23  ;;  %v331_v9 = vadd.f32 %v330_v31, %v329_v26  ;;  %v356_v10 = vadd.f32 %v355_v35, %v354_v27  ;;  %v379_v13 = vsel %vm22_vm2, %v1138_v3, 0.0 }
  0xe8   :  { %v1144_v16 = vmax.f32 %v401_v4, 0.0  ;;  %v1146_v17 = vmax.f32 %v426_v5, 0.0  ;;  %v450_v18 = vadd.f32 4.5, %v1062_v11  ;;  %598 = vst.msk [vmem:[#allocation3 + $0x12] sm:$0x1] %vm135_vm5, %v597_v7  ;;  %v380_v20 = vrot.slane %v379_v13, 4 }
  0xe9   :  { %622 = vst.msk [vmem:[#allocation3 + $0x13] sm:$0x1] %vm135_vm5, %v621_v8  ;;  %v332_v39 = vrot.slane %v331_v9, 2  ;;  %v357_v19 = vrot.slane %v356_v10, 2  ;;  %v474_v21 = vadd.f32 -3.5, %v1064_v12  ;;  %v475_v29 = vadd.f32 5.5, %v1062_v11 }
  0xea   :  { %v1152_v22 = vld [vmem:[#allocation2 + $0x10] sm:$0xf]  ;;  %v404_v24 = vsel %vm22_vm2, %v1144_v16, 0.0  ;;  %v429_v25 = vsel %vm22_vm2, %v1146_v17, 0.0  ;;  %v451_v28 = vmin.f32 %v449_v6, %v450_v18  ;;  %v381_v36 = vadd.f32 %v380_v20, %v379_v13  ;;  %v403_v8 = vld [vmem:[#allocation2 + $0xb] sm:$0x1] }
  0xeb   :  { %933 = vmatpush3.msk.msra.mxu0 %vm657_vm6, %v1152_v22  ;;  %v333_v32 = vadd.f32 %v332_v39, %v331_v9  ;;  %v358_v33 = vadd.f32 %v357_v19, %v356_v10  ;;  %v405_v37 = vrot.slane %v404_v24, 4  ;;  %v430_v40 = vrot.slane %v429_v25, 4  ;;  %v428_v19 = vld [vmem:[#allocation2 + $0xc] sm:$0x1] }
  0xec   :  { %934 = vmatprep.subr.mxu0 %v988_v1  ;;  %v1162_v41 = vmax.f32 %v451_v28, 0.0  ;;  %v476_v42 = vmin.f32 %v474_v21, %v475_v29  ;;  %v499_v43 = vadd.f32 -4.5, %v1064_v12  ;;  %v382_v47 = vrot.slane %v381_v36, 2 }
  0xed   :  { %v334_v45 = vrot.slane %v333_v32, 1  ;;  %v359_v46 = vrot.slane %v358_v33, 1  ;;  %v406_v48 = vadd.f32 %v405_v37, %v404_v24  ;;  %v431_v50 = vadd.f32 %v430_v40, %v429_v25 }
  0xee   :  { %v454_v51 = vsel %vm22_vm2, %v1162_v41, 0.0  ;;  %v1167_v52 = vmax.f32 %v476_v42, 0.0  ;;  %v500_v53 = vadd.f32 6.5, %v1062_v11  ;;  %v383_v56 = vadd.f32 %v382_v47, %v381_v36 }
  0xef   :  { %v335_v54 = vadd.f32 %v334_v45, %v333_v32  ;;  %v360_v55 = vadd.f32 %v359_v46, %v358_v33  ;;  %v407_v57 = vrot.slane %v406_v48, 2  ;;  %v432_v61 = vrot.slane %v431_v50, 2 }
  0xf0   :  { %v1170_v60 = vld [vmem:[#allocation3 + $0x10] sm:$0xf]  ;;  %v455_v62 = vrot.slane %v454_v51, 4  ;;  %v479_v63 = vsel %vm22_vm2, %v1167_v52, 0.0  ;;  %v501_v0 = vmin.f32 %v499_v43, %v500_v53  ;;  %v384_v27 = vrot.slane %v383_v56, 1 }
  0xf1   :  { %918 = vmatpush3.msk.msra.mxu1 %vm657_vm6, %v1170_v60  ;;  %v336_v23 = vadd.f32 %v335_v54, %v328_v44  ;;  %v361_v26 = vadd.f32 %v360_v55, %v353_v49  ;;  %v1177_v30 = vshrl.u32 %v632_v15, 7  ;;  %v408_v38 = vadd.f32 %v407_v57, %v406_v48  ;;  %v453_v44 = vld [vmem:[#allocation2 + $0xd] sm:$0x1]  ;;  %v478_v53 = vld [vmem:[#allocation2 + $0xe] sm:$0x1] }
  0xf2   :  { %v433_v2 = vadd.f32 %v432_v61, %v431_v50  ;;  %v456_v31 = vadd.f32 %v455_v62, %v454_v51  ;;  %v480_v35 = vrot.slane %v479_v63, 4  ;;  %919 = vmatprep.subr.mxu1 %v988_v1  ;;  %v385_v4 = vadd.f32 %v384_v27, %v383_v56 }
  0xf3   :  { %337 = vst.msk [vmem:[#allocation2 + $0x8] sm:$0x1] %vm135_vm5, %v336_v23  ;;  %362 = vst.msk [vmem:[#allocation2 + $0x9] sm:$0x1] %vm135_vm5, %v361_v26  ;;  %v1182_v5 = vmax.f32 %v501_v0, 0.0  ;;  %v339_v6 = vmul.f32 %v1067_v14, %v1118_v58  ;;  %v364_v7 = vmul.f32 %v1067_v14, %v1123_v59  ;;  %v409_v9 = vrot.slane %v408_v38, 1 }
  0xf4   :  { %v434_v10 = vrot.slane %v433_v2, 1  ;;  %v457_v13 = vrot.slane %v456_v31, 2  ;;  %v481_v18 = vadd.f32 %v480_v35, %v479_v63  ;;  %v386_v39 = vadd.f32 %v385_v4, %v378_v34  ;;  %v503_v35 = vld [vmem:[#allocation2 + $0xf] sm:$0x1] }
  0xf5   :  { %v504_v20 = vsel %vm22_vm2, %v1182_v5, 0.0  ;;  %v340_v21 = vsel %vm22_vm2, %v339_v6, 0.0  ;;  %v365_v24 = vsel %vm22_vm2, %v364_v7, 0.0  ;;  %v410_v25 = vadd.f32 %v409_v9, %v408_v38  ;;  %v363_v9 = vld [vmem:[#allocation3 + $0x9] sm:$0x1] }
  0xf6   :  { %v435_v28 = vadd.f32 %v434_v10, %v433_v2  ;;  %v458_v58 = vadd.f32 %v457_v13, %v456_v31  ;;  %v482_v29 = vrot.slane %v481_v18, 2  ;;  %387 = vst.msk [vmem:[#allocation2 + $0xa] sm:$0x1] %vm135_vm5, %v386_v39  ;;  %v505_v59 = vrot.slane %v504_v20, 4 }
  0xf7   :  { %v341_v32 = vrot.slane %v340_v21, 4  ;;  %v366_v33 = vrot.slane %v365_v24, 4  ;;  %v389_v36 = vmul.f32 %v1067_v14, %v1138_v3  ;;  %v411_v37 = vadd.f32 %v410_v25, %v403_v8  ;;  %v338_v8 = vld [vmem:[#allocation3 + $0x8] sm:$0x1] }
  0xf8   :  { %v436_v40 = vadd.f32 %v435_v28, %v428_v19  ;;  %v459_v42 = vrot.slane %v458_v58, 1  ;;  %v483_v43 = vadd.f32 %v482_v29, %v481_v18  ;;  %v506_v45 = vadd.f32 %v505_v59, %v504_v20 }
  0xf9   :  { %v342_v46 = vadd.f32 %v341_v32, %v340_v21  ;;  %v367_v47 = vadd.f32 %v366_v33, %v365_v24  ;;  %v390_v48 = vsel %vm22_vm2, %v389_v36, 0.0  ;;  %412 = vst.msk [vmem:[#allocation2 + $0xb] sm:$0x1] %vm135_vm5, %v411_v37  ;;  %v414_v3 = vmul.f32 %v1067_v14, %v1144_v16  ;;  %v388_v33 = vld [vmem:[#allocation3 + $0xa] sm:$0x1] }
  0xfa   :  { %437 = vst.msk [vmem:[#allocation2 + $0xc] sm:$0x1] %vm135_vm5, %v436_v40  ;;  %v460_v49 = vadd.f32 %v459_v42, %v458_v58  ;;  %v484_v50 = vrot.slane %v483_v43, 1  ;;  %v391_v51 = vrot.slane %v390_v48, 4  ;;  %v507_v54 = vrot.slane %v506_v45, 2 }
  0xfb   :  { %v343_v55 = vrot.slane %v342_v46, 2  ;;  %v368_v56 = vrot.slane %v367_v47, 2  ;;  %v439_v57 = vmul.f32 %v1067_v14, %v1146_v17  ;;  %v415_v0 = vsel %vm22_vm2, %v414_v3, 0.0 }
  0xfc   :  { %v461_v61 = vadd.f32 %v460_v49, %v453_v44  ;;  %v485_v62 = vadd.f32 %v484_v50, %v483_v43  ;;  %v392_v63 = vadd.f32 %v391_v51, %v390_v48  ;;  %v508_v23 = vadd.f32 %v507_v54, %v506_v45  ;;  %v413_v48 = vld [vmem:[#allocation3 + $0xb] sm:$0x1] }
  0xfd   :  { %v344_v26 = vadd.f32 %v343_v55, %v342_v46  ;;  %v369_v27 = vadd.f32 %v368_v56, %v367_v47  ;;  %v416_v34 = vrot.slane %v415_v0, 4  ;;  %v440_v2 = vsel %vm22_vm2, %v439_v57, 0.0 }
  0xfe   :  { %462 = vst.msk [vmem:[#allocation2 + $0xd] sm:$0x1] %vm135_vm5, %v461_v61  ;;  %v486_v38 = vadd.f32 %v485_v62, %v478_v53  ;;  %v393_v16 = vrot.slane %v392_v63, 2  ;;  %v464_v31 = vmul.f32 %v1067_v14, %v1162_v41  ;;  %v509_v17 = vrot.slane %v508_v23, 1 }
  0xff   :  { %v345_v4 = vrot.slane %v344_v26, 1  ;;  %v370_v6 = vrot.slane %v369_v27, 1  ;;  %v417_v7 = vadd.f32 %v416_v34, %v415_v0  ;;  %v441_v13 = vrot.slane %v440_v2, 4 }
 0x100   :  { %487 = vst.msk [vmem:[#allocation2 + $0xe] sm:$0x1] %vm135_vm5, %v486_v38  ;;  %v394_v10 = vadd.f32 %v393_v16, %v392_v63  ;;  %v465_v18 = vsel %vm22_vm2, %v464_v31, 0.0  ;;  %v489_v39 = vmul.f32 %v1067_v14, %v1167_v52  ;;  %v510_v19 = vadd.f32 %v509_v17, %v508_v23  ;;  %v438_v63 = vld [vmem:[#allocation3 + $0xc] sm:$0x1] }
 0x101   :  { %v346_v20 = vadd.f32 %v345_v4, %v344_v26  ;;  %v371_v21 = vadd.f32 %v370_v6, %v369_v27  ;;  %v418_v41 = vrot.slane %v417_v7, 2  ;;  %v442_v25 = vadd.f32 %v441_v13, %v440_v2  ;;  %v463_v2 = vld [vmem:[#allocation3 + $0xd] sm:$0x1]  ;;  %v488_v13 = vld [vmem:[#allocation3 + $0xe] sm:$0x1] }
 0x102   :  { %v395_v24 = vrot.slane %v394_v10, 1  ;;  %v466_v28 = vrot.slane %v465_v18, 4  ;;  %v490_v58 = vsel %vm22_vm2, %v489_v39, 0.0  ;;  %v511_v29 = vadd.f32 %v510_v19, %v503_v35 }
 0x103   :  { %v347_v59 = vadd.f32 %v346_v20, %v338_v8  ;;  %v372_v32 = vadd.f32 %v371_v21, %v363_v9  ;;  %v419_v36 = vadd.f32 %v418_v41, %v417_v7  ;;  %v443_v40 = vrot.slane %v442_v25, 2 }
 0x104   :  { %v396_v37 = vadd.f32 %v395_v24, %v394_v10  ;;  %v467_v42 = vadd.f32 %v466_v28, %v465_v18  ;;  %v491_v43 = vrot.slane %v490_v58, 4  ;;  %512 = vst.msk [vmem:[#allocation2 + $0xf] sm:$0x1] %vm135_vm5, %v511_v29  ;;  %v514_v44 = vmul.f32 %v1067_v14, %v1182_v5 }
 0x105   :  { %348 = vst.msk [vmem:[#allocation3 + $0x8] sm:$0x1] %vm135_vm5, %v347_v59  ;;  %373 = vst.msk [vmem:[#allocation3 + $0x9] sm:$0x1] %vm135_vm5, %v372_v32  ;;  %v420_v52 = vrot.slane %v419_v36, 1  ;;  %v122_v45 = vadd.f32 -8.5, %v1062_v11  ;;  %v444_v49 = vadd.f32 %v443_v40, %v442_v25 }
 0x106   :  { %v149_v46 = vadd.f32 9.5, %v1064_v12  ;;  %v397_v47 = vadd.f32 %v396_v37, %v388_v33  ;;  %v468_v50 = vrot.slane %v467_v42, 2  ;;  %v492_v51 = vadd.f32 %v491_v43, %v490_v58  ;;  %v513_v40 = vld [vmem:[#allocation3 + $0xf] sm:$0x1] }
 0x107   :  { %v421_v3 = vadd.f32 %v420_v52, %v419_v36  ;;  %v515_v53 = vsel %vm22_vm2, %v514_v44, 0.0  ;;  %v123_v54 = vmax.f32 %v122_v45, 0.0  ;;  %v150_v55 = vadd.f32 -7.5, %v1062_v11 }
 0x108   :  { %398 = vst.msk [vmem:[#allocation3 + $0xa] sm:$0x1] %vm135_vm5, %v397_v47  ;;  %v445_v56 = vrot.slane %v444_v49, 1  ;;  %v469_v57 = vadd.f32 %v468_v50, %v467_v42  ;;  %v493_v5 = vrot.slane %v492_v51, 2  ;;  %v516_v61 = vrot.slane %v515_v53, 4 }
 0x109   :  { %v422_v62 = vadd.f32 %v421_v3, %v413_v48  ;;  %v1222_v0 = vmin.f32 %v123_v54, 1.0  ;;  %v151_v23 = vmin.f32 %v149_v46, %v150_v55  ;;  %v174_v26 = vadd.f32 8.5, %v1064_v12 }
 0x10a   :  { %v446_v27 = vadd.f32 %v445_v56, %v444_v49  ;;  %v470_v34 = vrot.slane %v469_v57, 1  ;;  %v494_v38 = vadd.f32 %v493_v5, %v492_v51  ;;  %v517_v16 = vadd.f32 %v516_v61, %v515_v53 }
 0x10b   :  { %423 = vst.msk [vmem:[#allocation3 + $0xb] sm:$0x1] %vm135_vm5, %v422_v62  ;;  %v127_v31 = vsel %vm22_vm2, %v1222_v0, 0.0  ;;  %v1228_v35 = vmax.f32 %v151_v23, 0.0  ;;  %v175_v17 = vadd.f32 -6.5, %v1062_v11  ;;  %v199_v4 = vadd.f32 7.5, %v1064_v12 }
 0x10c   :  { %v1232_v6 = vld [vmem:[#allocation2 + $0x8] sm:$0xff]  ;;  %v447_v7 = vadd.f32 %v446_v27, %v438_v63  ;;  %v471_v8 = vadd.f32 %v470_v34, %v469_v57  ;;  %v495_v9 = vrot.slane %v494_v38, 1  ;;  %v518_v10 = vrot.slane %v517_v16, 2  ;;  %v125_v63 = vld [vmem:[#allocation2] sm:$0x1] }
 0x10d   :  { %935 = vmatpush3.msra.mxu0 %v1232_v6  ;;  %v128_v18 = vrot.slane %v127_v31, 4  ;;  %v154_v39 = vsel %vm22_vm2, %v1228_v35, 0.0  ;;  %v176_v19 = vmin.f32 %v174_v26, %v175_v17  ;;  %v200_v20 = vadd.f32 -5.5, %v1062_v11 }
 0x10e   :  { %936 = vmatprep.subr.mxu0 %v988_v1  ;;  %448 = vst.msk [vmem:[#allocation3 + $0xc] sm:$0x1] %vm135_vm5, %v447_v7  ;;  %v472_v21 = vadd.f32 %v471_v8, %v463_v2  ;;  %v496_v41 = vadd.f32 %v495_v9, %v494_v38  ;;  %v519_v24 = vadd.f32 %v518_v10, %v517_v16  ;;  %v155_v25 = vrot.slane %v154_v39, 4  ;;  %v153_v16 = vld [vmem:[#allocation2 + $0x1] sm:$0x1] }
 0x10f   :  { %v129_v28 = vadd.f32 %v128_v18, %v127_v31  ;;  %v1240_v58 = vmax.f32 %v176_v19, 0.0  ;;  %v201_v29 = vmin.f32 %v199_v4, %v200_v20  ;;  %v224_v59 = vadd.f32 6.5, %v1064_v12 }
 0x110   :  { %473 = vst.msk [vmem:[#allocation3 + $0xd] sm:$0x1] %vm135_vm5, %v472_v21  ;;  %v497_v32 = vadd.f32 %v496_v41, %v488_v13  ;;  %v520_v33 = vrot.slane %v519_v24, 1  ;;  %v156_v36 = vadd.f32 %v155_v25, %v154_v39  ;;  %v225_v37 = vadd.f32 -4.5, %v1062_v11  ;;  %v178_v41 = vld [vmem:[#allocation2 + $0x2] sm:$0x1] }
 0x111   :  { %v130_v42 = vrot.slane %v129_v28, 2  ;;  %v179_v43 = vsel %vm22_vm2, %v1240_v58, 0.0  ;;  %v1247_v52 = vmax.f32 %v201_v29, 0.0  ;;  %v249_v44 = vadd.f32 5.5, %v1064_v12 }
 0x112   :  { %498 = vst.msk [vmem:[#allocation3 + $0xe] sm:$0x1] %vm135_vm5, %v497_v32  ;;  %v521_v45 = vadd.f32 %v520_v33, %v519_v24  ;;  %v157_v46 = vrot.slane %v156_v36, 2  ;;  %v180_v47 = vrot.slane %v179_v43, 4  ;;  %v226_v48 = vmin.f32 %v224_v59, %v225_v37  ;;  %v203_v37 = vld [vmem:[#allocation2 + $0x3] sm:$0x1] }
 0x113   :  { %v131_v49 = vadd.f32 %v130_v42, %v129_v28  ;;  %v204_v50 = vsel %vm22_vm2, %v1247_v52, 0.0  ;;  %v250_v51 = vadd.f32 -3.5, %v1062_v11  ;;  %v274_v3 = vadd.f32 4.5, %v1064_v12 }
 0x114   :  { %v522_v53 = vadd.f32 %v521_v45, %v513_v40  ;;  %v158_v54 = vadd.f32 %v157_v46, %v156_v36  ;;  %v181_v55 = vadd.f32 %v180_v47, %v179_v43  ;;  %v205_v56 = vrot.slane %v204_v50, 4 }
 0x115   :  { %v132_v57 = vrot.slane %v131_v49, 1  ;;  %v1255_v5 = vmax.f32 %v226_v48, 0.0  ;;  %v251_v61 = vmin.f32 %v249_v44, %v250_v51  ;;  %v275_v62 = vadd.f32 -2.5, %v1062_v11 }
 0x116   :  { %523 = vst.msk [vmem:[#allocation3 + $0xf] sm:$0x1] %vm135_vm5, %v522_v53  ;;  %v159_v23 = vrot.slane %v158_v54, 1  ;;  %v182_v26 = vrot.slane %v181_v55, 2  ;;  %v206_v27 = vadd.f32 %v205_v56, %v204_v50  ;;  %v299_v34 = vadd.f32 3.5, %v1064_v12 }
 0x117   :  { %v133_v38 = vadd.f32 %v132_v57, %v131_v49  ;;  %v229_v2 = vsel %vm22_vm2, %v1255_v5, 0.0  ;;  %v1262_v31 = vmax.f32 %v251_v61, 0.0  ;;  %v276_v17 = vmin.f32 %v274_v3, %v275_v62 }
 0x118   :  { %v160_v4 = vadd.f32 %v159_v23, %v158_v54  ;;  %v183_v7 = vadd.f32 %v182_v26, %v181_v55  ;;  %v207_v8 = vrot.slane %v206_v27, 2  ;;  %v230_v9 = vrot.slane %v229_v2, 4  ;;  %v228_v55 = vld [vmem:[#allocation2 + $0x4] sm:$0x1] }
 0x119   :  { %v134_v10 = vadd.f32 %v133_v38, %v125_v63  ;;  %v254_v13 = vsel %vm22_vm2, %v1262_v31, 0.0  ;;  %v1266_v18 = vmax.f32 %v276_v17, 0.0  ;;  %v300_v12 = vadd.f32 -1.5, %v1062_v11  ;;  %v253_v17 = vld [vmem:[#allocation2 + $0x5] sm:$0x1] }
 0x11a   :  { %v161_v39 = vadd.f32 %v160_v4, %v153_v16  ;;  %v184_v19 = vrot.slane %v183_v7, 1  ;;  %v208_v20 = vadd.f32 %v207_v8, %v206_v27  ;;  %v231_v21 = vadd.f32 %v230_v9, %v229_v2 }
 0x11b   :  { %136 = vst.msk [vmem:[#allocation2] sm:$0x1] %vm135_vm5, %v134_v10  ;;  %v255_v24 = vrot.slane %v254_v13, 4  ;;  %v279_v25 = vsel %vm22_vm2, %v1266_v18, 0.0  ;;  %v301_v28 = vmin.f32 %v299_v34, %v300_v12  ;;  %v138_v29 = vmul.f32 %v1067_v14, %v1222_v0 }
 0x11c   :  { %162 = vst.msk [vmem:[#allocation2 + $0x1] sm:$0x1] %vm135_vm5, %v161_v39  ;;  %v185_v59 = vadd.f32 %v184_v19, %v183_v7  ;;  %v209_v32 = vrot.slane %v208_v20, 1  ;;  %v232_v11 = vrot.slane %v231_v21, 2  ;;  %v280_v33 = vrot.slane %v279_v25, 4 }
 0x11d   :  { %v1275_v36 = vld [vmem:[#allocation3 + $0x8] sm:$0xff]  ;;  %v256_v40 = vadd.f32 %v255_v24, %v254_v13  ;;  %v1277_v42 = vmax.f32 %v301_v28, 0.0  ;;  %v139_v43 = vsel %vm22_vm2, %v138_v29, 0.0  ;;  %v164_v44 = vmul.f32 %v1067_v14, %v1228_v35  ;;  %v137_v29 = vld [vmem:[#allocation3] sm:$0x1] }
 0x11e   :  { %920 = vmatpush3.msra.mxu1 %v1275_v36  ;;  %v186_v0 = vadd.f32 %v185_v59, %v178_v41  ;;  %v210_v45 = vadd.f32 %v209_v32, %v208_v20  ;;  %v233_v46 = vadd.f32 %v232_v11, %v231_v21  ;;  %v1284_v47 = vand.u32 127, %v632_v15 }
 0x11f   :  { %v257_v48 = vrot.slane %v256_v40, 2  ;;  %v281_v49 = vadd.f32 %v280_v33, %v279_v25  ;;  %v304_v50 = vsel %vm22_vm2, %v1277_v42, 0.0  ;;  %921 = vmatprep.subr.mxu1 %v988_v1  ;;  %v140_v51 = vrot.slane %v139_v43, 4 }
 0x120   :  { %187 = vst.msk [vmem:[#allocation2 + $0x2] sm:$0x1] %vm135_vm5, %v186_v0  ;;  %v211_v3 = vadd.f32 %v210_v45, %v203_v37  ;;  %v234_v35 = vrot.slane %v233_v46, 1  ;;  %v305_v53 = vrot.slane %v304_v50, 4  ;;  %v165_v54 = vsel %vm22_vm2, %v164_v44, 0.0 }
 0x121   :  { %v258_v56 = vadd.f32 %v257_v48, %v256_v40  ;;  %v282_v57 = vrot.slane %v281_v49, 2  ;;  %v141_v15 = vadd.f32 %v140_v51, %v139_v43  ;;  %v166_v61 = vrot.slane %v165_v54, 4  ;;  %v303_v37 = vld [vmem:[#allocation2 + $0x7] sm:$0x1]  ;;  %v163_v45 = vld [vmem:[#allocation3 + $0x1] sm:$0x1] }
 0x122   :  { %212 = vst.msk [vmem:[#allocation2 + $0x3] sm:$0x1] %vm135_vm5, %v211_v3  ;;  %v235_v62 = vadd.f32 %v234_v35, %v233_v46  ;;  %v306_v63 = vadd.f32 %v305_v53, %v304_v50  ;;  %v189_v23 = vmul.f32 %v1067_v14, %v1240_v58  ;;  %v214_v26 = vmul.f32 %v1067_v14, %v1247_v52  ;;  %v278_v58 = vld [vmem:[#allocation2 + $0x6] sm:$0x1] }
 0x123   :  { %v259_v27 = vrot.slane %v258_v56, 1  ;;  %v283_v34 = vadd.f32 %v282_v57, %v281_v49  ;;  %v142_v38 = vrot.slane %v141_v15, 2  ;;  %v167_v16 = vadd.f32 %v166_v61, %v165_v54 }
 0x124   :  { %v236_v2 = vadd.f32 %v235_v62, %v228_v55  ;;  %v307_v4 = vrot.slane %v306_v63, 2  ;;  %v190_v7 = vsel %vm22_vm2, %v189_v23, 0.0  ;;  %v215_v8 = vsel %vm22_vm2, %v214_v26, 0.0  ;;  %v188_v23 = vld [vmem:[#allocation3 + $0x2] sm:$0x1] }
 0x125   :  { %v260_v9 = vadd.f32 %v259_v27, %v258_v56  ;;  %v284_v10 = vrot.slane %v283_v34, 1  ;;  %v143_v13 = vadd.f32 %v142_v38, %v141_v15  ;;  %v168_v12 = vrot.slane %v167_v16, 2  ;;  %v213_v26 = vld [vmem:[#allocation3 + $0x3] sm:$0x1] }
 0x126   :  { %237 = vst.msk [vmem:[#allocation2 + $0x4] sm:$0x1] %vm135_vm5, %v236_v2  ;;  %v308_v39 = vadd.f32 %v307_v4, %v306_v63  ;;  %v191_v52 = vrot.slane %v190_v7, 4  ;;  %v216_v19 = vrot.slane %v215_v8, 4  ;;  %v239_v20 = vmul.f32 %v1067_v14, %v1255_v5 }
 0x127   :  { %v261_v21 = vadd.f32 %v260_v9, %v253_v17  ;;  %v285_v41 = vadd.f32 %v284_v10, %v283_v34  ;;  %v144_v24 = vrot.slane %v143_v13, 1  ;;  %v169_v25 = vadd.f32 %v168_v12, %v167_v16  ;;  %v238_v10 = vld [vmem:[#allocation3 + $0x4] sm:$0x1] }
 0x128   :  { %v309_v28 = vrot.slane %v308_v39, 1  ;;  %v192_v59 = vadd.f32 %v191_v52, %v190_v7  ;;  %v217_v32 = vadd.f32 %v216_v19, %v215_v8  ;;  %v240_v11 = vsel %vm22_vm2, %v239_v20, 0.0 }
 0x129   :  { %262 = vst.msk [vmem:[#allocation2 + $0x5] sm:$0x1] %vm135_vm5, %v261_v21  ;;  %v286_v33 = vadd.f32 %v285_v41, %v278_v58  ;;  %v145_v40 = vadd.f32 %v144_v24, %v143_v13  ;;  %v170_v43 = vrot.slane %v169_v25, 1  ;;  %v241_v44 = vrot.slane %v240_v11, 4 }
 0x12a   :  { %v310_v0 = vadd.f32 %v309_v28, %v308_v39  ;;  %v193_v5 = vrot.slane %v192_v59, 2  ;;  %v218_v46 = vrot.slane %v217_v32, 2  ;;  %v264_v48 = vmul.f32 %v1067_v14, %v1262_v31 }
 0x12b   :  { %287 = vst.msk [vmem:[#allocation2 + $0x6] sm:$0x1] %vm135_vm5, %v286_v33  ;;  %v146_v49 = vadd.f32 %v145_v40, %v137_v29  ;;  %v171_v50 = vadd.f32 %v170_v43, %v169_v25  ;;  %v242_v51 = vadd.f32 %v241_v44, %v240_v11  ;;  %v289_v3 = vmul.f32 %v1067_v14, %v1266_v18  ;;  %v263_v25 = vld [vmem:[#allocation3 + $0x5] sm:$0x1]  ;;  %v313_v44 = vld [vmem:[#allocation3 + $0x7] sm:$0x1] }
 0x12c   :  { %v311_v35 = vadd.f32 %v310_v0, %v303_v37  ;;  %v194_v53 = vadd.f32 %v193_v5, %v192_v59  ;;  %v219_v54 = vadd.f32 %v218_v46, %v217_v32  ;;  %v265_v55 = vsel %vm22_vm2, %v264_v48, 0.0  ;;  %v288_v59 = vld [vmem:[#allocation3 + $0x6] sm:$0x1] }
 0x12d   :  { %147 = vst.msk [vmem:[#allocation3] sm:$0x1] %vm135_vm5, %v146_v49  ;;  %v172_v56 = vadd.f32 %v171_v50, %v163_v45  ;;  %v243_v57 = vrot.slane %v242_v51, 2  ;;  %v266_v15 = vrot.slane %v265_v55, 4  ;;  %v290_v31 = vsel %vm22_vm2, %v289_v3, 0.0 }
 0x12e   :  { %312 = vst.msk [vmem:[#allocation2 + $0x7] sm:$0x1] %vm135_vm5, %v311_v35  ;;  %v195_v61 = vrot.slane %v194_v53, 1  ;;  %v220_v62 = vrot.slane %v219_v54, 1  ;;  %v291_v63 = vrot.slane %v290_v31, 4  ;;  %v314_v18 = vmul.f32 %v1067_v14, %v1277_v42 }
 0x12f   :  { %vm638_vm7 = vcmp.le.s32.totalorder %v1284_v47, %v1177_v30  ;;  %173 = vst.msk [vmem:[#allocation3 + $0x1] sm:$0x1] %vm135_vm5, %v172_v56  ;;  %v244_v27 = vadd.f32 %v243_v57, %v242_v51  ;;  %v267_v34 = vadd.f32 %v266_v15, %v265_v55  ;;  %v634_v9 = vadd.s32 8, %v1177_v30 }
 0x130   :  { %v196_v38 = vadd.f32 %v195_v61, %v194_v53  ;;  %v221_v16 = vadd.f32 %v220_v62, %v219_v54  ;;  %v292_v2 = vadd.f32 %v291_v63, %v290_v31  ;;  %v315_v17 = vsel %vm22_vm2, %v314_v18, 0.0 }
 0x131   :  { %v245_v4 = vrot.slane %v244_v27, 1  ;;  %v268_v7 = vrot.slane %v267_v34, 2  ;;  %v316_v8 = vrot.slane %v315_v17, 4  ;;  %v878_v52 = vsel %vm638_vm7, 1.0, %v988_v1 }
 0x132   :  { %v197_v14 = vadd.f32 %v196_v38, %v188_v23  ;;  %v222_v42 = vadd.f32 %v221_v16, %v213_v26  ;;  %v293_v13 = vrot.slane %v292_v2, 2  ;;  %vm639_vm9 = vcmp.le.s32.totalorder %v1284_v47, %v634_v9 }
 0x133   :  { %v246_v12 = vadd.f32 %v245_v4, %v244_v27  ;;  %v269_v58 = vadd.f32 %v268_v7, %v267_v34  ;;  %v317_v39 = vadd.f32 %v316_v8, %v315_v17  ;;  %v879_v33 = vsel %vm639_vm9, 1.0, %v988_v1 }
 0x134   :  { %198 = vst.msk [vmem:[#allocation3 + $0x2] sm:$0x1] %vm135_vm5, %v197_v14  ;;  %223 = vst.msk [vmem:[#allocation3 + $0x3] sm:$0x1] %vm135_vm5, %v222_v42  ;;  %v294_v19 = vadd.f32 %v293_v13, %v292_v2  ;;  %v635_v46 = vadd.s32 16, %v1177_v30  ;;  %v834_v48 = vsel %vm25_vm3, %v1170_v60, 0.0 }
 0x135   :  { %v626_v20 = vld [vmem:[#allocation2] sm:$0xff]  ;;  %v247_v21 = vadd.f32 %v246_v12, %v238_v10  ;;  %v270_v41 = vrot.slane %v269_v58, 1  ;;  %v318_v24 = vrot.slane %v317_v39, 2 }
 0x136   :  { %937 = vmatpush3.msra.mxu0 %v626_v20  ;;  %v295_v28 = vrot.slane %v294_v19, 1  ;;  %vm640_vm10 = vcmp.le.s32.totalorder %v1284_v47, %v635_v46 }
 0x137   :  { %939 = vmatmul.mubr.msk.f32.vlgmr.msra.gmra.mxu0 %vm647_vm8, %v878_v52  ;;  %248 = vst.msk [vmem:[#allocation3 + $0x4] sm:$0x1] %vm135_vm5, %v247_v21  ;;  %v271_v29 = vadd.f32 %v270_v41, %v269_v58  ;;  %v319_v32 = vadd.f32 %v318_v24, %v317_v39  ;;  %v880_v30 = vsel %vm640_vm10, 1.0, %v988_v1 }
 0x138   :  { %v296_v11 = vadd.f32 %v295_v28, %v294_v19  ;;  %941 = vmatprep.mubr.msk.f32.mxu0 %vm989_vm0, %v988_v1 }
 0x139   :  { %v272_v37 = vadd.f32 %v271_v29, %v263_v25  ;;  %v320_v40 = vrot.slane %v319_v32, 1 }
 0x13a   :  { %v297_v43 = vadd.f32 %v296_v11, %v288_v59 }
 0x13b   :  { %273 = vst.msk [vmem:[#allocation3 + $0x5] sm:$0x1] %vm135_vm5, %v272_v37  ;;  %v321_v0 = vadd.f32 %v320_v40, %v319_v32  ;;  %942 = vmatmul.mubr.msk.f32.gmra.mxu0 %vm647_vm8, %v879_v33 }
 0x13c   :  { %298 = vst.msk [vmem:[#allocation3 + $0x6] sm:$0x1] %vm135_vm5, %v297_v43 }
 0x13d   :  { %v322_v45 = vadd.f32 %v321_v0, %v313_v44 }
 0x13f   :  { %323 = vst.msk [vmem:[#allocation3 + $0x7] sm:$0x1] %vm135_vm5, %v322_v45 }
 0x146   :  { %v629_v5 = vld [vmem:[#allocation3] sm:$0xff] }
 0x147   :  { %922 = vmatpush3.msra.mxu1 %v629_v5 }
 0x148   :  { %924 = vmatmul.mubr.msk.f32.vlgmr.msra.gmra.mxu1 %vm647_vm8, %v878_v52  ;;  %947 = vmatprep.subr.mxu1 %v988_v1 }
 0x149   :  { %950 = vmatpush3.msk.msra.mxu1 %vm657_vm6, %v1152_v22  ;;  %926 = vmatprep.mubr.msk.f32.mxu1 %vm989_vm0, %v988_v1  ;;  %v831_v22 = vsel %vm22_vm2, %v1275_v36, 0.0 }
 0x14a   :  { %948 = vmatprep.subr.mxu1 %v988_v1 }
 0x14b   :  { %951 = vmatpush3.msra.mxu1 %v1232_v6  ;;  %v830_v6 = vsel %vm22_vm2, %v629_v5, 0.0 }
 0x14c   :  { %927 = vmatmul.mubr.msk.f32.gmra.mxu1 %vm647_vm8, %v879_v33  ;;  %949 = vmatprep.subr.mxu1 %v988_v1  ;;  %v832_v47 = vadd.f32 %v831_v22, %v830_v6 }
 0x14d   :  { %952 = vmatpush3.msra.mxu1 %v626_v20  ;;  %929 = vmatprep.mubr.msk.f32.mxu1 %vm989_vm0, %v988_v1 }
 0x14e   :  { %v835_v49 = vadd.f32 %v834_v48, %v832_v47 }
 0x150   :  { %930 = vmatmul.mubr.msk.f32.gmra.mxu1 %vm647_vm8, %v880_v30  ;;  %v836_v50 = vrot.slane %v835_v49, 4 }
 0x151   :  { %944 = vmatprep.mubr.msk.f32.mxu1 %vm989_vm0, %v988_v1 }
 0x152   :  { %v837_v35 = vadd.f32 %v836_v50, %v835_v49 }
 0x154   :  { %945 = vmatmul.mubr.msk.f32.vlgmr.msra.gmra.mxu1 %vm647_vm8, %v880_v30  ;;  %v838_v55 = vrot.slane %v837_v35, 2 }
 0x156   :  { %v839_v1 = vadd.f32 %v838_v55, %v837_v35 }
 0x158   :  { %v840_v56 = vrot.slane %v839_v1, 1 }
 0x15a   :  { %v841_v31 = vadd.f32 %v840_v56, %v839_v1 }
 0x1f7   :  { %v810_v51 = vpop.f32.mrf.mxu0 }
 0x1f8   :  { %v811_v62 = vadd.f32 1e-16, %v810_v51 }
 0x1f9   :  { %v940_v3 = vpop.f32.mrf.mxu0 }
 0x1fb   :  { %v815_v53 = vpop.f32.mrf.mxu0 }
 0x1fc   :  { %v816_v15 = vadd.f32 1e-16, %v815_v53 }
 0x1fd   :  { %v943_v54 = vpop.f32.mrf.mxu0 }
 0x1fe   :  { %958 = vrcp.f32 %v816_v15 }
 0x1ff   :  { %960 = vrcp.f32 %v841_v31 }
 0x200   :  { %962 = vrcp.f32 %v811_v62 }
 0x208   :  { %v727_v57 = vpop.f32.mrf.mxu1 }
 0x20a   :  { %v925_v61 = vpop.f32.mrf.mxu1 }
 0x20b   :  { %v959_v16 = vpop.eup %958 }
 0x20c   :  { %v732_v63 = vpop.f32.mrf.mxu1  ;;  %v961_v2 = vpop.eup %960 }
 0x20d   :  { %v963_v17 = vpop.eup %962  ;;  %v827_v4 = vmul.f32 %v959_v16, %v732_v63  ;;  %v844_v8 = vmul.f32 %v961_v2, %v1275_v36  ;;  %v843_v9 = vmul.f32 %v961_v2, %v629_v5  ;;  %v845_v58 = vmul.f32 %v961_v2, %v1170_v60 }
 0x20e   :  { %v928_v18 = vpop.f32.mrf.mxu1  ;;  %v825_v7 = vmul.f32 %v963_v17, %v727_v57 }
 0x20f   :  { %v847_v14 = vmul.f32 %v844_v8, %v827_v4 }
 0x210   :  { %v737_v23 = vpop.f32.mrf.mxu1  ;;  %v846_v42 = vmul.f32 %v843_v9, %v825_v7 }
 0x211   :  { %v850_v13 = vsel %vm22_vm2, %v847_v14, 0.0 }
 0x212   :  { %v931_v26 = vpop.f32.mrf.mxu1  ;;  %v849_v39 = vsel %vm22_vm2, %v846_v42, 0.0 }
 0x213   :  { %v851_v19 = vadd.f32 %v850_v13, %v849_v39 }
 0x214   :  { %v820_v27 = vpop.f32.mrf.mxu1 }
 0x215   :  { %v821_v34 = vadd.f32 1e-16, %v820_v27 }
 0x216   :  { %v946_v38 = vpop.f32.mrf.mxu1 }
 0x217   :  { %964 = vrcp.f32 %v821_v34 }
 0x224   :  { %v965_v10 = vpop.eup %964 }
 0x225   :  { %v829_v12 = vmul.f32 %v965_v10, %v737_v23 }
 0x227   :  { %v848_v52 = vmul.f32 %v845_v58, %v829_v12 }
 0x229   :  { %v852_v20 = vsel %vm25_vm3, %v848_v52, 0.0 }
 0x22a   :  { %v853_v21 = vadd.f32 %v852_v20, %v851_v19 }
 0x22c   :  { %v854_v41 = vrot.slane %v853_v21, 4 }
 0x22e   :  { %v855_v24 = vadd.f32 %v854_v41, %v853_v21 }
 0x230   :  { %v856_v25 = vrot.slane %v855_v24, 2 }
 0x232   :  { %v857_v36 = vadd.f32 %v856_v25, %v855_v24 }
 0x234   :  { %v858_v28 = vrot.slane %v857_v36, 1 }
 0x236   :  { %v859_v29 = vadd.f32 %v858_v28, %v857_v36 }
 0x238   :  { %860 = vst.msk [vmem:[#allocation4] sm:$0x1] %vm135_vm5, %v859_v29 }
 0x239   :  { %977 = shalt.err (!%p974_p4)
}
 0x23a   :  { %870 = dma.vmem_to_hbm [thread:$0]  %s868_s26, 16, %s1372_s4, [#allocation5]  }
 0x23b   :  { %986 = dma.done.wait [#allocation5], 16  }
 0x23c   :  { %987 = vsyncadd [#allocation5], 4294967280 }
 0x23d   :  { %874 = vsyncpa [#allocation5], 1 }

</bundles_post_ra>
